<compile_context>
chip_gen: v6e
topology: v6e:2x2x1
jax: 0.10.0
libtpu: 0.0.40
codegen_flags: <defaults>
</compile_context>

<pallas_src>
import jax
import jax.numpy as jnp
from jax.experimental import pallas as pl
from jax.experimental.pallas import tpu as pltpu

LN_EPS = 1e-5

# 2048 removed: 512/1024-row tiles already sit near the HBM roofline and 2048
# only adds VMEM pressure (v7x has 64 MiB / TensorCore).
_TILE_CANDIDATES = (1024, 512, 256, 128, 64, 32, 16, 8)


def _vmem_capacity_bytes():
    """Per-TensorCore VMEM capacity; conservative (v7x) fallback if unknown."""
    try:
        return int(pltpu.get_tpu_info().vmem_capacity_bytes)
    except Exception:
        return 64 * 1024 * 1024


def _vmem_estimate_bytes(tile, feat_dims, hidden_dim, output_dim,
                         in_bytes, out_bytes):
    """Per-step VMEM footprint: double-buffered edge tiles + single-buffered
    resident weights + ~4 live [tile, hidden] intermediates."""
    cat_dim = sum(feat_dims)
    io = 2 * tile * cat_dim * in_bytes + 2 * tile * output_dim * out_bytes
    weights = in_bytes * (cat_dim * hidden_dim
                          + hidden_dim * hidden_dim
                          + hidden_dim * output_dim)
    small = 4 * (2 * hidden_dim + 3 * output_dim)          # biases + LN params
    intermediates = tile * (4 * 4 * hidden_dim             # f32 matmul/SiLU temps
                            + 2 * in_bytes * hidden_dim    # bf16 recast copies
                            + 4 * output_dim)              # LN temporaries
    return io + weights + small + intermediates


def _choose_edge_tile(num_edges, feat_dims, hidden_dim, output_dim,
                      in_bytes, out_bytes, vmem_budget_bytes):
    fitting = [t for t in _TILE_CANDIDATES
               if _vmem_estimate_bytes(t, feat_dims, hidden_dim, output_dim,
                                       in_bytes, out_bytes) <= vmem_budget_bytes]
    if not fitting:
        return _TILE_CANDIDATES[-1]
    # Prefer the largest fitting tile that keeps >= 4 grid steps (2 per core on
    # a v7x megacore), then >= 2, then whatever fits.
    for min_steps in (4, 2, 1):
        for t in fitting:
            if pl.cdiv(num_edges, t) >= min_steps:
                return t
    return fitting[-1]


def _make_mlp_kernel(n_parts):
    """Kernel over one edge tile.  The first-layer input arrives either as one
    packed [tile, cat_dim] block (n_parts == 1) or as n_parts separate pieces
    with a matching row-split of W1."""

    def kernel(*refs):
        feat_refs = refs[:n_parts]
        w1_refs = refs[n_parts:2 * n_parts]
        (b1_ref, w2_ref, b2_ref, w3_ref, b3_ref,
         g_ref, beta_ref, o_ref) = refs[2 * n_parts:]

        # ---- Linear 1 over the (possibly virtual) concat.
        h = jnp.dot(feat_refs[0][...], w1_refs[0][...],
                    preferred_element_type=jnp.float32)
        for f_ref, w_ref in zip(feat_refs[1:], w1_refs[1:]):
            h = h + jnp.dot(f_ref[...], w_ref[...],
                            preferred_element_type=jnp.float32)
        h = h + b1_ref[...]
        h = h * jax.nn.sigmoid(h)                # SiLU in f32 (sigmoid -> EUP)

        # ---- Linear 2 + SiLU
        h = jnp.dot(h.astype(w2_ref.dtype), w2_ref[...],
                    preferred_element_type=jnp.float32) + b2_ref[...]
        h = h * jax.nn.sigmoid(h)

        # ---- Linear 3 (output projection)
        h = jnp.dot(h.astype(w3_ref.dtype), w3_ref[...],
                    preferred_element_type=jnp.float32) + b3_ref[...]

        # ---- Fused LayerNorm (single sweep: var = E[h^2] - mean^2, f32).
        inv_d = 1.0 / h.shape[-1]
        mean = jnp.sum(h, axis=-1, keepdims=True) * inv_d
        ex2 = jnp.sum(h * h, axis=-1, keepdims=True) * inv_d
        var = jnp.maximum(ex2 - mean * mean, 0.0)
        inv = jax.lax.rsqrt(var + LN_EPS)
        o_ref[...] = (((h - mean) * inv) * g_ref[...]
                      + beta_ref[...]).astype(o_ref.dtype)

    return kernel


def mesh_graph_edge_mlp_concat(efeat, nfeat, src_idx, dst_idx, params, *,
                               edge_tile=None,
                               compute_dtype=jnp.bfloat16,
                               out_dtype=None,
                               vmem_budget_bytes=None):
    """Forward pass of MeshGraphEdgeMLPConcat.

    efeat:   [E, efeat_dim]  edge features
    nfeat:   [N, node_dim]   node features (used for both src and dst gathers)
    src_idx: [E] int32       source node per edge
    dst_idx: [E] int32       destination node per edge
    params:  dict with w1 [cat_dim, hidden], b1 [1, hidden], w2, b2, w3, b3,
             ln_gamma, ln_beta.  Weights stored [in, out] (transposed vs
             torch.nn.Linear).
    """
    E, efeat_dim = efeat.shape
    node_dim = nfeat.shape[1]
    src_dim = dst_dim = node_dim
    cat_dim = efeat_dim + src_dim + dst_dim
    assert params["w1"].shape[0] == cat_dim
    hidden_dim = params["w1"].shape[1]
    output_dim = params["w3"].shape[1]

    # bf16 output by default: the kernel is HBM-bound, f32 output would double
    # the write traffic and the double-buffered out tile.  Pass
    # out_dtype=jnp.float32 for exact dtype parity with the PyTorch module.
    out_dtype = compute_dtype if out_dtype is None else out_dtype
    in_bytes = jnp.dtype(compute_dtype).itemsize
    out_bytes = jnp.dtype(out_dtype).itemsize

    # TODO(synk): move the src/dst gather in-kernel (whole-nfeat VMEM block +
    # jnp.take for small graphs, scalar-prefetch DMA gather for large ones) to
    # avoid the HBM round trip of the gathered node features.
    nfeat_c = nfeat.astype(compute_dtype)
    efeat_c = efeat.astype(compute_dtype)
    src_feat = nfeat_c[src_idx]
    dst_feat = nfeat_c[dst_idx]

    w1 = params["w1"]
    # Lane-dense first layer: if any concat piece is narrower than a vreg lane
    # width (128), pack [efeat | src | dst] and run ONE K=cat_dim matmul.  The
    # gathered features are materialized in HBM either way, so packing adds no
    # traffic; it removes masked narrow loads and two tiny-K MXU passes.
    use_packed = min(efeat_dim, src_dim, dst_dim) < 128
    if use_packed:
        feats = [jnp.concatenate([efeat_c, src_feat, dst_feat], axis=-1)]
        feat_dims = [cat_dim]
        w1_parts = [w1.astype(compute_dtype)]
    else:
        feats = [efeat_c, src_feat, dst_feat]
        feat_dims = [efeat_dim, src_dim, dst_dim]
        w1_parts = [w1[:efeat_dim].astype(compute_dtype),
                    w1[efeat_dim:efeat_dim + src_dim].astype(compute_dtype),
                    w1[efeat_dim + src_dim:].astype(compute_dtype)]

    # Generation-aware VMEM budgeting (v7x: 64 MiB/TC, v5e/v6e: 128 MiB).
    vmem_cap = _vmem_capacity_bytes()
    if vmem_budget_bytes is None:
        vmem_budget_bytes = int(vmem_cap * 0.80)

    if edge_tile is None:
        edge_tile = _choose_edge_tile(E, feat_dims, hidden_dim, output_dim,
                                      in_bytes, out_bytes, vmem_budget_bytes)
    edge_tile = max(8, ((int(edge_tile) + 7) // 8) * 8)   # sublane-aligned rows

    # Pad the edge dimension up to a tile multiple (arbitrary E supported).
    num_tiles = int(pl.cdiv(E, edge_tile))
    e_pad = num_tiles * edge_tile
    if e_pad != E:
        pad = e_pad - E
        feats = [jnp.pad(f, ((0, pad), (0, 0))) for f in feats]

    w2 = params["w2"].astype(compute_dtype)
    w3 = params["w3"].astype(compute_dtype)
    b1 = params["b1"].astype(jnp.float32)
    b2 = params["b2"].astype(jnp.float32)
    b3 = params["b3"].astype(jnp.float32)
    gamma = params["ln_gamma"].astype(jnp.float32)
    beta = params["ln_beta"].astype(jnp.float32)

    est = _vmem_estimate_bytes(edge_tile, feat_dims, hidden_dim, output_dim,
                               in_bytes, out_bytes)
    vmem_limit = int(min(max(est * 5 // 4 + (4 << 20), 16 << 20),
                         int(vmem_cap * 0.85)))

    def resident():
        # Whole array resident in VMEM for the entire grid: single copy,
        # no per-step DMA, no double buffering.
        return pl.BlockSpec(memory_space=pltpu.MemorySpace.VMEM)

    feat_specs = [pl.BlockSpec((edge_tile, d), lambda i: (i, 0))
                  for d in feat_dims]

    out = pl.pallas_call(
        _make_mlp_kernel(len(feats)),
        out_shape=jax.ShapeDtypeStruct((e_pad, output_dim), out_dtype),
        grid_spec=pl.GridSpec(
            grid=(num_tiles,),
            in_specs=(feat_specs
                      + [resident() for _ in w1_parts]      # W1 block(s)
                      + [resident(),                        # b1
                         resident(),                        # W2
                         resident(),                        # b2
                         resident(),                        # W3
                         resident(),                        # b3
                         resident(),                        # ln gamma
                         resident()]),                      # ln beta
            out_specs=pl.BlockSpec((edge_tile, output_dim), lambda i: (i, 0)),
        ),
        compiler_params=pltpu.CompilerParams(
            dimension_semantics=("parallel",),
            vmem_limit_bytes=vmem_limit,
        ),
    )(*feats, *w1_parts, b1, w2, b2, w3, b3, gamma, beta)

    if e_pad != E:
        out = out[:E]
    return out


def init_params(key, cat_dim, hidden_dim, output_dim):
    """Deterministic parameter init (nn.Linear-style; weights stored [in, out])."""
    ks = jax.random.split(key, 6)

    def lin(kw, kb, fan_in, fan_out):
        bound = 1.0 / jnp.sqrt(fan_in)
        w = jax.random.uniform(kw, (fan_in, fan_out), jnp.float32, -bound, bound)
        b = jax.random.uniform(kb, (1, fan_out), jnp.float32, -bound, bound)
        return w, b

    w1, b1 = lin(ks[0], ks[1], cat_dim, hidden_dim)
    w2, b2 = lin(ks[2], ks[3], hidden_dim, hidden_dim)
    w3, b3 = lin(ks[4], ks[5], hidden_dim, output_dim)
    return {
        "w1": w1, "b1": b1,
        "w2": w2, "b2": b2,
        "w3": w3, "b3": b3,
        "ln_gamma": jnp.ones((1, output_dim), jnp.float32),
        "ln_beta": jnp.zeros((1, output_dim), jnp.float32),
    }


def _reference(efeat, nfeat, src_idx, dst_idx, p, compute_dtype=jnp.bfloat16):
    """Pure-JAX reference following the same matmul-dtype path as the kernel."""
    x = jnp.concatenate([efeat, nfeat[src_idx], nfeat[dst_idx]], axis=-1)

    def dot(a, w):
        return jnp.dot(a.astype(compute_dtype), w.astype(compute_dtype),
                       preferred_element_type=jnp.float32)

    h = dot(x, p["w1"]) + p["b1"]
    h = h * jax.nn.sigmoid(h)
    h = dot(h, p["w2"]) + p["b2"]
    h = h * jax.nn.sigmoid(h)
    h = dot(h, p["w3"]) + p["b3"]
    mu = jnp.mean(h, axis=-1, keepdims=True)
    var = jnp.mean((h - mu) ** 2, axis=-1, keepdims=True)
    return (h - mu) * jax.lax.rsqrt(var + LN_EPS) * p["ln_gamma"] + p["ln_beta"]


if __name__ == "__main__":
    key = jax.random.PRNGKey(0)
    k_e, k_n, k_s, k_d, k_p = jax.random.split(key, 5)

    # Small synthetic graph.  hidden/output dims are lane-aligned (128) so
    # stores are unmasked; E deliberately NOT a tile multiple to exercise the
    # padding path; feature dims < 128 exercise the lane-dense packed path.
    num_nodes = 64
    num_edges = 1000
    efeat_dim = 64
    node_dim = 32                        # src_dim == dst_dim == node_dim
    hidden_dim = 128
    output_dim = 128
    cat_dim = efeat_dim + 2 * node_dim   # 128

    efeat = jax.random.normal(k_e, (num_edges, efeat_dim), jnp.float32)
    nfeat = jax.random.normal(k_n, (num_nodes, node_dim), jnp.float32)
    src_idx = jax.random.randint(k_s, (num_edges,), 0, num_nodes, jnp.int32)
    dst_idx = jax.random.randint(k_d, (num_edges,), 0, num_nodes, jnp.int32)

    params = init_params(k_p, cat_dim, hidden_dim, output_dim)

    # Default fast path: bf16 matmuls, bf16 output.
    out = mesh_graph_edge_mlp_concat(efeat, nfeat, src_idx, dst_idx, params)
    out = jax.block_until_ready(out)
    ref = _reference(efeat, nfeat, src_idx, dst_idx, params,
                     compute_dtype=jnp.bfloat16)
    assert out.shape == (num_edges, output_dim)
    assert jnp.allclose(out.astype(jnp.float32), ref, atol=3e-2, rtol=3e-2), \
        "bf16 path mismatch vs reference"

    # f32 validation path (guards against precision drift vs. the f32 module).
    out_f32 = mesh_graph_edge_mlp_concat(efeat, nfeat, src_idx, dst_idx, params,
                                         compute_dtype=jnp.float32,
                                         out_dtype=jnp.float32)
    out_f32 = jax.block_until_ready(out_f32)
    ref_f32 = _reference(efeat, nfeat, src_idx, dst_idx, params,
                         compute_dtype=jnp.float32)
    assert jnp.allclose(out_f32, ref_f32, atol=2e-3, rtol=2e-3), \
        "f32 path mismatch vs reference"

    print("KERNEL_OK")
</pallas_src>

<mosaic_0001>
module attributes {stable_mosaic.version = 11 : i64} {
  func.func @kernel(%arg0: i32, %arg1: memref<256x128xbf16, #tpu.memory_space<vmem>>, %arg2: memref<128x128xbf16, #tpu.memory_space<vmem>>, %arg3: memref<1x128xf32, #tpu.memory_space<vmem>>, %arg4: memref<128x128xbf16, #tpu.memory_space<vmem>>, %arg5: memref<1x128xf32, #tpu.memory_space<vmem>>, %arg6: memref<128x128xbf16, #tpu.memory_space<vmem>>, %arg7: memref<1x128xf32, #tpu.memory_space<vmem>>, %arg8: memref<1x128xf32, #tpu.memory_space<vmem>>, %arg9: memref<1x128xf32, #tpu.memory_space<vmem>>, %arg10: memref<256x128xbf16, #tpu.memory_space<vmem>>) attributes {dimension_semantics = [#tpu.dimension_semantics<parallel>], iteration_bounds = array<i64: 4>, scalar_prefetch = 0 : i64, scratch_operands = 0 : i64, tpu.core_type = #tpu.core_type<tc>, window_params = [{transform_indices = @transform_0, window_bounds = array<i64: 256, 128>}, {pipeline_mode = #tpu.pipeline_mode<synchronous>, transform_indices = @transform_1, window_bounds = array<i64: 128, 128>}, {pipeline_mode = #tpu.pipeline_mode<synchronous>, transform_indices = @transform_2, window_bounds = array<i64: 1, 128>}, {pipeline_mode = #tpu.pipeline_mode<synchronous>, transform_indices = @transform_3, window_bounds = array<i64: 128, 128>}, {pipeline_mode = #tpu.pipeline_mode<synchronous>, transform_indices = @transform_4, window_bounds = array<i64: 1, 128>}, {pipeline_mode = #tpu.pipeline_mode<synchronous>, transform_indices = @transform_5, window_bounds = array<i64: 128, 128>}, {pipeline_mode = #tpu.pipeline_mode<synchronous>, transform_indices = @transform_6, window_bounds = array<i64: 1, 128>}, {pipeline_mode = #tpu.pipeline_mode<synchronous>, transform_indices = @transform_7, window_bounds = array<i64: 1, 128>}, {pipeline_mode = #tpu.pipeline_mode<synchronous>, transform_indices = @transform_8, window_bounds = array<i64: 1, 128>}, {transform_indices = @transform_9, window_bounds = array<i64: 256, 128>}]} {
    %c0 = arith.constant 0 : index
    %c0_0 = arith.constant 0 : index
    %0 = vector.load %arg1[%c0, %c0_0] : memref<256x128xbf16, #tpu.memory_space<vmem>>, vector<256x128xbf16>
    %c0_1 = arith.constant 0 : index
    %c0_2 = arith.constant 0 : index
    %1 = vector.load %arg2[%c0_1, %c0_2] : memref<128x128xbf16, #tpu.memory_space<vmem>>, vector<128x128xbf16>
    %cst = arith.constant dense<0.000000e+00> : vector<256x128xf32>
    %2 = tpu.matmul %0, %1, %cst {dimension_numbers = #tpu.dot_dimension_numbers<[1], [0], [0], [1], [0, 0, 1, 1], [], []>} : vector<256x128xbf16>, vector<128x128xbf16>, vector<256x128xf32> -> vector<256x128xf32>
    %c0_3 = arith.constant 0 : index
    %c0_4 = arith.constant 0 : index
    %3 = vector.load %arg3[%c0_3, %c0_4] : memref<1x128xf32, #tpu.memory_space<vmem>>, vector<1x128xf32>
    %4 = vector.broadcast %3 : vector<1x128xf32> to vector<256x128xf32>
    %5 = arith.addf %2, %4 : vector<256x128xf32>
    %6 = arith.negf %5 : vector<256x128xf32>
    %7 = math.exp %6 : vector<256x128xf32>
    %cst_5 = arith.constant 1.000000e+00 : f32
    %8 = vector.broadcast %cst_5 : f32 to vector<256x128xf32>
    %9 = arith.addf %8, %7 : vector<256x128xf32>
    %10 = arith.divf %8, %9 : vector<256x128xf32>
    %11 = arith.mulf %5, %10 : vector<256x128xf32>
    %12 = arith.truncf %11 : vector<256x128xf32> to vector<256x128xbf16>
    %c0_6 = arith.constant 0 : index
    %c0_7 = arith.constant 0 : index
    %13 = vector.load %arg4[%c0_6, %c0_7] : memref<128x128xbf16, #tpu.memory_space<vmem>>, vector<128x128xbf16>
    %cst_8 = arith.constant dense<0.000000e+00> : vector<256x128xf32>
    %14 = tpu.matmul %12, %13, %cst_8 {dimension_numbers = #tpu.dot_dimension_numbers<[1], [0], [0], [1], [0, 0, 1, 1], [], []>} : vector<256x128xbf16>, vector<128x128xbf16>, vector<256x128xf32> -> vector<256x128xf32>
    %c0_9 = arith.constant 0 : index
    %c0_10 = arith.constant 0 : index
    %15 = vector.load %arg5[%c0_9, %c0_10] : memref<1x128xf32, #tpu.memory_space<vmem>>, vector<1x128xf32>
    %16 = vector.broadcast %15 : vector<1x128xf32> to vector<256x128xf32>
    %17 = arith.addf %14, %16 : vector<256x128xf32>
    %18 = arith.negf %17 : vector<256x128xf32>
    %19 = math.exp %18 : vector<256x128xf32>
    %cst_11 = arith.constant 1.000000e+00 : f32
    %20 = vector.broadcast %cst_11 : f32 to vector<256x128xf32>
    %21 = arith.addf %20, %19 : vector<256x128xf32>
    %22 = arith.divf %20, %21 : vector<256x128xf32>
    %23 = arith.mulf %17, %22 : vector<256x128xf32>
    %24 = arith.truncf %23 : vector<256x128xf32> to vector<256x128xbf16>
    %c0_12 = arith.constant 0 : index
    %c0_13 = arith.constant 0 : index
    %25 = vector.load %arg6[%c0_12, %c0_13] : memref<128x128xbf16, #tpu.memory_space<vmem>>, vector<128x128xbf16>
    %cst_14 = arith.constant dense<0.000000e+00> : vector<256x128xf32>
    %26 = tpu.matmul %24, %25, %cst_14 {dimension_numbers = #tpu.dot_dimension_numbers<[1], [0], [0], [1], [0, 0, 1, 1], [], []>} : vector<256x128xbf16>, vector<128x128xbf16>, vector<256x128xf32> -> vector<256x128xf32>
    %c0_15 = arith.constant 0 : index
    %c0_16 = arith.constant 0 : index
    %27 = vector.load %arg7[%c0_15, %c0_16] : memref<1x128xf32, #tpu.memory_space<vmem>>, vector<1x128xf32>
    %28 = vector.broadcast %27 : vector<1x128xf32> to vector<256x128xf32>
    %29 = arith.addf %26, %28 : vector<256x128xf32>
    %cst_17 = arith.constant dense<0.000000e+00> : vector<256xf32>
    %30 = vector.multi_reduction <add>, %29, %cst_17 [1] : vector<256x128xf32> to vector<256xf32>
    %31 = vector.shape_cast %30 : vector<256xf32> to vector<256x1xf32>
    %cst_18 = arith.constant 7.812500e-03 : f32
    %32 = vector.broadcast %cst_18 : f32 to vector<256x1xf32>
    %33 = arith.mulf %31, %32 : vector<256x1xf32>
    %34 = arith.mulf %29, %29 : vector<256x128xf32>
    %cst_19 = arith.constant dense<0.000000e+00> : vector<256xf32>
    %35 = vector.multi_reduction <add>, %34, %cst_19 [1] : vector<256x128xf32> to vector<256xf32>
    %36 = vector.shape_cast %35 : vector<256xf32> to vector<256x1xf32>
    %cst_20 = arith.constant 7.812500e-03 : f32
    %37 = vector.broadcast %cst_20 : f32 to vector<256x1xf32>
    %38 = arith.mulf %36, %37 : vector<256x1xf32>
    %39 = arith.mulf %33, %33 : vector<256x1xf32>
    %40 = arith.subf %38, %39 : vector<256x1xf32>
    %cst_21 = arith.constant 0.000000e+00 : f32
    %41 = vector.broadcast %cst_21 : f32 to vector<256x1xf32>
    %42 = arith.maximumf %40, %41 : vector<256x1xf32>
    %cst_22 = arith.constant 9.99999974E-6 : f32
    %43 = vector.broadcast %cst_22 : f32 to vector<256x1xf32>
    %44 = arith.addf %42, %43 : vector<256x1xf32>
    %45 = math.rsqrt %44 : vector<256x1xf32>
    %46 = vector.broadcast %33 : vector<256x1xf32> to vector<256x128xf32>
    %47 = arith.subf %29, %46 : vector<256x128xf32>
    %48 = vector.broadcast %45 : vector<256x1xf32> to vector<256x128xf32>
    %49 = arith.mulf %47, %48 : vector<256x128xf32>
    %c0_23 = arith.constant 0 : index
    %c0_24 = arith.constant 0 : index
    %50 = vector.load %arg8[%c0_23, %c0_24] : memref<1x128xf32, #tpu.memory_space<vmem>>, vector<1x128xf32>
    %51 = vector.broadcast %50 : vector<1x128xf32> to vector<256x128xf32>
    %52 = arith.mulf %49, %51 : vector<256x128xf32>
    %c0_25 = arith.constant 0 : index
    %c0_26 = arith.constant 0 : index
    %53 = vector.load %arg9[%c0_25, %c0_26] : memref<1x128xf32, #tpu.memory_space<vmem>>, vector<1x128xf32>
    %54 = vector.broadcast %53 : vector<1x128xf32> to vector<256x128xf32>
    %55 = arith.addf %52, %54 : vector<256x128xf32>
    %56 = arith.truncf %55 : vector<256x128xf32> to vector<256x128xbf16>
    %c0_27 = arith.constant 0 : index
    %c0_28 = arith.constant 0 : index
    %57 = vector.load %arg10[%c0_27, %c0_28] : memref<256x128xbf16, #tpu.memory_space<vmem>>, vector<256x128xbf16>
    tpu.vector_store %arg10[%c0_27, %c0_28], %56 {strides = array<i32>} : memref<256x128xbf16, #tpu.memory_space<vmem>>, vector<256x128xbf16>,
    return
  }
  func.func @transform_0(%arg0: i32) -> (i32, i32) {
    %c0_i32 = arith.constant 0 : i32
    %c0_i32_0 = arith.constant 0 : i32
    return %arg0, %c0_i32 : i32, i32
  }
  func.func @transform_1(%arg0: i32) -> (i32, i32) {
    %c0_i32 = arith.constant 0 : i32
    %c0_i32_0 = arith.constant 0 : i32
    %c0_i32_1 = arith.constant 0 : i32
    return %c0_i32, %c0_i32_0 : i32, i32
  }
  func.func @transform_2(%arg0: i32) -> (i32, i32) {
    %c0_i32 = arith.constant 0 : i32
    %c0_i32_0 = arith.constant 0 : i32
    %c0_i32_1 = arith.constant 0 : i32
    return %c0_i32, %c0_i32_0 : i32, i32
  }
  func.func @transform_3(%arg0: i32) -> (i32, i32) {
    %c0_i32 = arith.constant 0 : i32
    %c0_i32_0 = arith.constant 0 : i32
    %c0_i32_1 = arith.constant 0 : i32
    return %c0_i32, %c0_i32_0 : i32, i32
  }
  func.func @transform_4(%arg0: i32) -> (i32, i32) {
    %c0_i32 = arith.constant 0 : i32
    %c0_i32_0 = arith.constant 0 : i32
    %c0_i32_1 = arith.constant 0 : i32
    return %c0_i32, %c0_i32_0 : i32, i32
  }
  func.func @transform_5(%arg0: i32) -> (i32, i32) {
    %c0_i32 = arith.constant 0 : i32
    %c0_i32_0 = arith.constant 0 : i32
    %c0_i32_1 = arith.constant 0 : i32
    return %c0_i32, %c0_i32_0 : i32, i32
  }
  func.func @transform_6(%arg0: i32) -> (i32, i32) {
    %c0_i32 = arith.constant 0 : i32
    %c0_i32_0 = arith.constant 0 : i32
    %c0_i32_1 = arith.constant 0 : i32
    return %c0_i32, %c0_i32_0 : i32, i32
  }
  func.func @transform_7(%arg0: i32) -> (i32, i32) {
    %c0_i32 = arith.constant 0 : i32
    %c0_i32_0 = arith.constant 0 : i32
    %c0_i32_1 = arith.constant 0 : i32
    return %c0_i32, %c0_i32_0 : i32, i32
  }
  func.func @transform_8(%arg0: i32) -> (i32, i32) {
    %c0_i32 = arith.constant 0 : i32
    %c0_i32_0 = arith.constant 0 : i32
    %c0_i32_1 = arith.constant 0 : i32
    return %c0_i32, %c0_i32_0 : i32, i32
  }
  func.func @transform_9(%arg0: i32) -> (i32, i32) {
    %c0_i32 = arith.constant 0 : i32
    %c0_i32_0 = arith.constant 0 : i32
    return %arg0, %c0_i32 : i32, i32
  }
}

</mosaic_0001>

<bundles_post_ra>
// kernel: tpu_custom_call.1
= control target key start
LH: loop header
LB: loop body
LE: loop exit
PB: predicated region body
PF: predicated region fallthrough
CT: control target
= control target key end

     0   :  { %s4764_s0 = inlined_call_operand.hbm [shape: bf16[1024,128], index: 0, kind: input, shape index: {}]   ;;  %s4765_s1 = inlined_call_operand.hbm [shape: bf16[128,128], index: 1, kind: input, shape index: {}]   ;;  %s4766_s2 = inlined_call_operand.vmem [shape: f32[1,128], index: 2, kind: input, shape index: {}]   ;;  %s4767_s3 = inlined_call_operand.hbm [shape: bf16[128,128], index: 3, kind: input, shape index: {}]   ;;  %s4768_s4 = inlined_call_operand.vmem [shape: f32[1,128], index: 4, kind: input, shape index: {}]   ;;  %s4769_s5 = inlined_call_operand.hbm [shape: bf16[128,128], index: 5, kind: input, shape index: {}]   ;;  %s4770_s6 = inlined_call_operand.vmem [shape: f32[1,128], index: 6, kind: input, shape index: {}]   ;;  %s4771_s7 = inlined_call_operand.vmem [shape: f32[1,128], index: 7, kind: input, shape index: {}]   ;;  %s4772_s8 = inlined_call_operand.vmem [shape: f32[1,128], index: 8, kind: input, shape index: {}]   ;;  %s4773_s9 = inlined_call_operand.hbm [shape: bf16[1024,128], index: 9, kind: output, shape index: {}]  }
   0x1   :  { %4780 = sst [smem:[#allocation15_spill]] %s4765_s1 }
   0x2   :  { %4781 = sst [smem:[#allocation16_spill]] %s4767_s3 }
   0x3   :  { %4782 = sst [smem:[#allocation17_spill]] %s4769_s5 }
   0x4   :  { %14 = vsyncpa [#allocation3], 0 }
   0x5   :  { %16 = vsyncpa [#allocation3 + $0x1], 0 }
   0x6   :  { %17 = vsyncpa [#allocation6], 0 }
   0x7   :  { %18 = vsyncpa [#allocation9], 0 }
   0x8   :  { %19 = vsyncpa [#allocation4], 0 }
   0x9   :  { %21 = vsyncpa [#allocation4 + $0x1], 0  ;;  %s3706_s30 = smov 0   ;;  %s3708_s10 = smov 0  }
   0xa   :  { %s3710_s11 = smov 0   ;;  %s3712_s12 = smov 0  }
   0xb LB: > { %s3727_s13 = sadd.s32 4294967295, %s3645_s12   ;;  %s2504_s14 = sadd.s32 4294967294, %s3645_s12   ;;  %s3645_s12 = sphi %s3712_s12, %s4805_s12   ;;  %s3641_s11 = sphi %s3710_s11, %s4804_s11   ;;  %s3637_s10 = sphi %s3708_s10, %s4803_s10   ;;  %s3633_s30 = sphi %s3706_s30, %s4802_s30  }
   0xc   : > { %p47_p0 = scmp.ne.s32.totalorder %s3637_s10, %s3633_s30  ;;  %p4774_p1 = scmp.eq.s32.totalorder %s3727_s13, 0 }
   0xd   : > { %p239_p2 = scmp.eq.s32.totalorder %s3727_s13, 3  ;;  %p245_p3 = scmp.eq.s32.totalorder %s2504_s14, 3 }
   0xe   : > { %p3736_p4 = por %p4774_p1, %p47_p0  ;;  %p2505_p5 = scmp.ge.s32.totalorder %s3645_s12, 1 }
   0xf   : > { %p3741_p6 = por %p245_p3, %p47_p0  ;;  %p252_p7 = scmp.lt.s32.totalorder %s3645_s12, 5 }
  0x10   : > { %s4783_s15 = scalar_select %p3736_p4, 1, 0 }
  0x11   : > { %s4784_s16 = scalar_select %p3741_p6, 1, 0 }
  0x12   : > { %p3746_p8 = pnand %p2505_p5, %p252_p7  ;;  %s3647_s18 = smov [#allocation5]  }
  0x13   : > { %s264_s19 = sshll.u32 %s3647_s18, 4  ;;  %s3648_s21 = smov [#allocation7]   ;;  %s265_s19 = int_to_ptr.vmem [resolvable:$true] %s264_s19 }
  0x14   : > { %s4785_s17 = scalar_select %p3746_p8, 1, 0 }
  0x15   : > { %p3042_p9 = pneg %p3746_p8  ;;  %s280_s22 = sshll.u32 %s3648_s21, 4  ;;  %s281_s22 = int_to_ptr.vmem [resolvable:$true] %s280_s22 }
  0x16   : > { %s3649_s23 = smov [#allocation8]   ;;  %s3478_s25 = scalar_lea.vmem %s265_s19, 1024 }
  0x17   : > { %p3754_p10 = pnand %p3042_p9, %p4774_p1  ;;  %s296_s24 = sshll.u32 %s3649_s23, 4  ;;  %s297_s24 = int_to_ptr.vmem [resolvable:$true] %s296_s24 }
  0x18   : > { %p3479_p12 = scmp.ne.s32.totalorder %s265_s19, %s3478_s25  ;;  %p3486_p3 = scmp.lt.s32.totalorder %s265_s19, %s265_s19 }
  0x19   : > { %p3469_p11 = pneg %p3754_p10  ;;  %p3487_p5 = scmp.lt.s32.totalorder %s3478_s25, %s3478_s25 }
  0x1b   : > { %p3481_p13 = pnand %p3479_p12, %p3469_p11  ;;  %p3488_p7 = por %p3487_p5, %p3486_p3 }
  0x1d   : > { %p3482_p0 = pneg %p3481_p13 }
  0x1f   : > { %p3489_p9 = pnand %p3488_p7, %p3482_p0 }
  0x21   : > { %3492 = shalt.err (!%p3489_p9)
}
  0x22   : > { %s4775_s26 = smov 64   ;;  %s4776_s27 = smov 4  }
  0x23   : > { %s4787_s1 = sld [smem:[#allocation15_spill]]  ;;  %s3504_s14 = scalar_lea.vmem %s281_s22, 1024 }
  0x24   : > { %p3505_p12 = scmp.ne.s32.totalorder %s281_s22, %s3504_s14  ;;  %p3512_p0 = scmp.lt.s32.totalorder %s281_s22, %s281_s22 }
  0x25   : > { %p3513_p5 = scmp.lt.s32.totalorder %s3504_s14, %s3504_s14 }
  0x26   : > { %p3507_p13 = pnand %p3505_p12, %p3469_p11 }
  0x27   : > { %p3514_p7 = por %p3513_p5, %p3512_p0 }
  0x28   : > { %p3508_p3 = pneg %p3507_p13 }
  0x29   : > { %3045 = dma.hbm_to_vmem [thread:$0]  (!%p3754_p10), %s4787_s1, 1024, %s265_s19, [#allocation6], %s4775_s26, %s4775_s26, %s4776_s27  }
  0x2a   : > { %p3515_p9 = pnand %p3514_p7, %p3508_p3 }
  0x2c   : > { %3518 = shalt.err (!%p3515_p9)
}
  0x2d   : > { %s4788_s3 = sld [smem:[#allocation16_spill]]  ;;  %s3530_s19 = scalar_lea.vmem %s297_s24, 1024 }
  0x2e   : > { %p3531_p1 = scmp.ne.s32.totalorder %s297_s24, %s3530_s19  ;;  %p3538_p0 = scmp.lt.s32.totalorder %s297_s24, %s297_s24 }
  0x2f   : > { %p3539_p3 = scmp.lt.s32.totalorder %s3530_s19, %s3530_s19 }
  0x30   : > { %p3533_p12 = pnand %p3531_p1, %p3469_p11 }
  0x31   : > { %p3540_p5 = por %p3539_p3, %p3538_p0 }
  0x32   : > { %p3534_p13 = pneg %p3533_p12 }
  0x33   : > { %3048 = dma.hbm_to_vmem [thread:$0]  (!%p3754_p10), %s4788_s3, 1024, %s281_s22, [#allocation6], %s4775_s26, %s4775_s26, %s4776_s27  }
  0x34   : > { %p3541_p7 = pnand %p3540_p5, %p3534_p13 }
  0x36   : > { %3544 = shalt.err (!%p3541_p7)
}
  0x37   : > { %s4789_s5 = sld [smem:[#allocation17_spill]]  ;;  %s3794_s22 = sadd.s32 1, %s3645_s12  }
  0x38   : > { %s31_s20 = ssub.s32 %s3645_s12, %s3794_s22  ;;  %s34_s28 = sadd.s32 1, %s3641_s11 }
  0x39   : > { %p32_p1 = scmp.eq.s32.totalorder %s31_s20, 0  ;;  %p41_p11 = scmp.ne.s32.totalorder %s3641_s11, %s3637_s10 }
  0x3a   : > { %p42_p9 = scmp.eq.s32.totalorder %s3645_s12, 0  ;;  %p3063_p12 = scmp.lt.s32.totalorder %s3645_s12, 4 }
  0x3b   : > { %s3804_s29 = scalar_select %p32_p1, %s3641_s11, %s34_s28  }
  0x3c   : > { %p43_p13 = por %p42_p9, %p41_p11  ;;  %p3808_p0 = por %p239_p2, %p41_p11 }
  0x3d   : > { %3051 = dma.hbm_to_vmem [thread:$0]  (!%p3754_p10), %s4789_s5, 1024, %s297_s24, [#allocation9], %s4775_s26, %s4775_s26, %s4776_s27  }
  0x3e   : > { %s4790_s14 = scalar_select %p3808_p0, 1, 0 }
  0x3f   : > { %s319_s18 = sand.u32 1, %s3641_s11   ;;  %s2665_s21 = sshll.u32 %s3645_s12, 11 }
  0x40   : > { %s2510_s24 = sshll.u32 %s319_s18, 7  ;;  %s3817_s25 = scalar_lea.hbm %s4764_s0, %s2665_s21 }
  0x41   : > { %s323_s20 = scalar_lea.vmem [#allocation2], %s2510_s24  ;;  %p3819_p10 = pnand %p3063_p12, %p43_p13 }
  0x42   : > { %s330_s28 = sshll.u32 %s323_s20, 4  ;;  %s3825_s27 = scalar_lea.sflag [#allocation3], %s319_s18  ;;  %s3823_s28 = int_to_ptr.vmem [resolvable:$true] %s330_s28 }
  0x43   : > { %s3545_s1 = scalar_lea.hbm %s3817_s25, 2048  ;;  %p3547_p3 = pneg %p3819_p10 }
  0x44   : > { %p3546_p2 = scmp.ne.s32.totalorder %s3817_s25, %s3545_s1  ;;  %s3550_s24 = scalar_lea.hbm %s4764_s0, 8192 }
  0x45   : > { %p3551_p1 = scmp.lt.s32.totalorder %s3817_s25, %s4764_s0  ;;  %p3552_p11 = scmp.lt.s32.totalorder %s3550_s24, %s3545_s1 }
  0x46   : > { %p3548_p5 = pnand %p3547_p3, %p3546_p2 }
  0x47   : > { %p3553_p9 = por %p3552_p11, %p3551_p1 }
  0x48   : > { %p3549_p7 = pneg %p3548_p5 }
  0x4a   : > { %p3554_p12 = pnand %p3553_p9, %p3549_p7 }
  0x4c   : > { %3557 = shalt.err (!%p3554_p12)
}
  0x4d   : > { %s3558_s18 = scalar_lea.vmem %s3823_s28, 2048  ;;  %s3652_s3 = smov [#allocation2]  }
  0x4e   : > { %p3559_p13 = scmp.ne.s32.totalorder %s3823_s28, %s3558_s18  ;;  %s3563_s5 = sshll.u32 %s3652_s3, 4  ;;  %s3564_s5 = int_to_ptr.vmem [resolvable:$false] %s3563_s5 }
  0x4f   : > { %s3565_s21 = scalar_lea.vmem %s3564_s5, 4096  ;;  %p3566_p5 = scmp.lt.s32.totalorder %s3823_s28, %s3564_s5 }
  0x50   : > { %p3561_p6 = pnand %p3559_p13, %p3547_p3  ;;  %p3567_p0 = scmp.lt.s32.totalorder %s3565_s21, %s3558_s18 }
  0x52   : > { %p3562_p2 = pneg %p3561_p6  ;;  %p3568_p4 = por %p3567_p0, %p3566_p5 }
  0x54   : > { %p3569_p8 = pnand %p3568_p4, %p3562_p2 }
  0x56   : > { %3572 = shalt.err (!%p3569_p8)
}
  0x57   : > { %s4792_s1 = smov 4   ;;  %s4793_s19 = smov 64  }
  0x58   : > { %3055 = dma.hbm_to_vmem [thread:$0]  (!%p3819_p10), %s3817_s25, 2048, %s3823_s28, %s3825_s27, %s4793_s19, %s4793_s19, %s4792_s1  }
  0x59   : > { %p4794_p6 = scmp.ne.s32.totalorder %s4785_s17, 0 }
  0x5a   : > { %s3852_s3 = sand.u32 (!%p4794_p6), 1, %s3637_s10   ;;  %p4795_p4 = scmp.ne.s32.totalorder (!%p4794_p6), %s4783_s15, 0 }
  0x5b   : > { %342 = sbr.rel (%p4794_p6) target bundleno = 1117 (0x45d), region = 56  ;;  %s2514_s5 = sshll.u32 (!%p4794_p6), %s3852_s3, 7 }
  0x5c   : > { %s345_s24 = scalar_lea.sflag (!%p4794_p6), [#allocation3], %s3852_s3  ;;  %s3858_s26 = scalar_lea.vmem (!%p4794_p6), [#allocation2], %s2514_s5 }
  0x60   : > { %3616 = dma.done.wait (%p4795_p4), %s345_s24, 2048  }
  0x61   : > { %3618 = vsyncadd (%p4795_p4), %s345_s24, 4294965248  ;;  %p4796_p8 = scmp.eq.s32.totalorder %s3727_s13, 0 }
  0x63   : > { %3620 = dma.done.wait (%p4796_p8), [#allocation6], 2048   ;;  %p4797_p0 = pmov %p4796_p8 }
  0x65   : > { %3622 = vsyncadd (%p4797_p0), [#allocation6], 4294965248  ;;  %p4798_p10 = pmov %p4797_p0 }
  0x66   : > { %p4799_p3 = pmov %p4797_p0 }
  0x67   : > { %3624 = dma.done.wait (%p4798_p10), [#allocation9], 1024  }
  0x68   : > { %3626 = vsyncadd (%p4799_p3), [#allocation9], 4294966272  ;;  %v3107_v0 = vld [vmem:[#allocation5 + $0x38] sm:$0xff]   ;;  %v3108_v1 = vld [vmem:[#allocation5 + $0x30] sm:$0xff]   ;;  %s4488_s19 = scalar_lea.vmem [#allocation10], %s2514_s5  ;;  %s2698_s5 = sshll.u32 %s3727_s13, 11 }
  0x69   : > { %2866 = vmatprep.subr.bf16.mxu0 %v3107_v0  ;;  %3010 = vmatprep.subr.bf16.mxu1 %v3107_v0  ;;  %v3109_v2 = vld [vmem:[#allocation5 + $0x28] sm:$0xff]   ;;  %v3110_v3 = vld [vmem:[#allocation5 + $0x20] sm:$0xff]   ;;  %v3111_v5 = vld [vmem:[#allocation5 + $0x18] sm:$0xff]   ;;  %s2402_s24 = sshll.u32 %s4488_s19, 4  ;;  %s4719_s17 = scalar_lea.hbm %s4773_s9, %s2698_s5  ;;  %s4721_s24 = int_to_ptr.vmem [resolvable:$true] %s2402_s24 }
  0x6a   : > { %2867 = vmatpush3.bf16.msra.mxu0 %v3107_v0  ;;  %3018 = vmatpush3.bf16.msra.mxu1 %v3107_v0  ;;  %v3115_v4 = vld [vmem:[%s3858_s26] sm:$0xff]   ;;  %v3112_v7 = vld [vmem:[#allocation5 + $0x10] sm:$0xff]   ;;  %v3113_v8 = vld [vmem:[#allocation5 + $0x8] sm:$0xff]   ;;  %s2389_s27 = scalar_lea.sflag [#allocation4], %s3852_s3  ;;  %s3573_s13 = scalar_lea.vmem %s4721_s24, 2048 }
  0x6b   : > { %2868 = vmatprep.subr.bf16.mxu0 %v3108_v1  ;;  %3011 = vmatprep.subr.bf16.mxu1 %v3108_v1  ;;  %v3122_v6 = vld [vmem:[%s3858_s26 + $0x40] sm:$0xff]   ;;  %v3116_v10 = vld [vmem:[%s3858_s26 + $0x8] sm:$0xff]   ;;  %v3117_v12 = vld [vmem:[%s3858_s26 + $0x10] sm:$0xff]   ;;  %p3574_p7 = scmp.ne.s32.totalorder %s4721_s24, %s3573_s13  ;;  %p4800_p1 = scmp.ne.s32.totalorder %s4790_s14, 0 }
  0x6c   : > { %2882 = vmatprep.mubr.bf16.mxu0 %v3115_v4  ;;  %2898 = vmatprep.mubr.bf16.mxu1 %v3122_v6  ;;  %v3114_v9 = vld [vmem:[#allocation5] sm:$0xff]   ;;  %v3124_v11 = vld [vmem:[%s3858_s26 + $0x48] sm:$0xff]   ;;  %v3125_v13 = vld [vmem:[%s3858_s26 + $0x50] sm:$0xff]   ;;  %s3653_s25 = smov [#allocation10]  }
  0x6d   : > { %v3118_v14 = vld [vmem:[%s3858_s26 + $0x18] sm:$0xff]   ;;  %v3119_v16 = vld [vmem:[%s3858_s26 + $0x20] sm:$0xff]   ;;  %v3120_v18 = vld [vmem:[%s3858_s26 + $0x28] sm:$0xff]   ;;  %p3575_p11 = pnand %p3574_p7, %p4800_p1  ;;  %s3577_s28 = sshll.u32 %s3653_s25, 4  ;;  %s3578_s28 = int_to_ptr.vmem [resolvable:$false] %s3577_s28 }
  0x6e   : > { %2869 = vmatpush3.bf16.msra.mxu0 %v3108_v1  ;;  %3019 = vmatpush3.bf16.msra.mxu1 %v3108_v1  ;;  %v3126_v15 = vld [vmem:[%s3858_s26 + $0x58] sm:$0xff]   ;;  %v3127_v17 = vld [vmem:[%s3858_s26 + $0x60] sm:$0xff]   ;;  %v3128_v19 = vld [vmem:[%s3858_s26 + $0x68] sm:$0xff]   ;;  %s3579_s23 = scalar_lea.vmem %s3578_s28, 4096  ;;  %p3580_p12 = scmp.lt.s32.totalorder %s4721_s24, %s3578_s28 }
  0x6f   : > { %2870 = vmatprep.subr.bf16.mxu0 %v3109_v2  ;;  %3012 = vmatprep.subr.bf16.mxu1 %v3109_v2  ;;  %v3121_v20 = vld [vmem:[%s3858_s26 + $0x30] sm:$0xff]   ;;  %v3123_v22 = vld [vmem:[%s3858_s26 + $0x38] sm:$0xff]   ;;  %v3133_v26 = vld [vmem:[#allocation7 + $0x28] sm:$0xff]   ;;  %p3576_p9 = pneg %p3575_p11  ;;  %p3581_p13 = scmp.lt.s32.totalorder %s3579_s23, %s3573_s13 }
  0x70   : > { %v3129_v21 = vld [vmem:[%s3858_s26 + $0x70] sm:$0xff]   ;;  %v3130_v23 = vld [vmem:[%s3858_s26 + $0x78] sm:$0xff]   ;;  %v3134_v27 = vld [vmem:[#allocation7 + $0x20] sm:$0xff]  }
  0x71   : > { %v3131_v24 = vld [vmem:[#allocation7 + $0x38] sm:$0xff]   ;;  %v3132_v25 = vld [vmem:[#allocation7 + $0x30] sm:$0xff]   ;;  %v3137_v30 = vld [vmem:[#allocation7 + $0x8] sm:$0xff]   ;;  %p3582_p2 = por %p3581_p13, %p3580_p12 }
  0x72   : > { %2871 = vmatpush3.bf16.msra.mxu0 %v3109_v2  ;;  %3020 = vmatpush3.bf16.msra.mxu1 %v3109_v2  ;;  %v3135_v28 = vld [vmem:[#allocation7 + $0x18] sm:$0xff]   ;;  %v3136_v29 = vld [vmem:[#allocation7 + $0x10] sm:$0xff]   ;;  %v3138_v31 = vld [vmem:[#allocation7] sm:$0xff]  }
  0x73   : > { %2872 = vmatprep.subr.bf16.mxu0 %v3110_v3  ;;  %3013 = vmatprep.subr.bf16.mxu1 %v3110_v3  ;;  %v3891_v32 = vld [vmem:[%s4766_s2] ss:$0 sm:$0xff]  ;;  %p3583_p5 = pnand %p3582_p2, %p3576_p9 }
  0x76   : > { %2873 = vmatpush3.bf16.msra.mxu0 %v3110_v3  ;;  %3021 = vmatpush3.bf16.msra.mxu1 %v3110_v3 }
  0x77   : > { %2874 = vmatprep.subr.bf16.mxu0 %v3111_v5  ;;  %3014 = vmatprep.subr.bf16.mxu1 %v3111_v5 }
  0x7a   : > { %2875 = vmatpush3.bf16.msra.mxu0 %v3111_v5  ;;  %3022 = vmatpush3.bf16.msra.mxu1 %v3111_v5 }
  0x7b   : > { %2876 = vmatprep.subr.bf16.mxu0 %v3112_v7  ;;  %3015 = vmatprep.subr.bf16.mxu1 %v3112_v7 }
  0x7e   : > { %2877 = vmatpush3.bf16.msra.mxu0 %v3112_v7  ;;  %3023 = vmatpush3.bf16.msra.mxu1 %v3112_v7 }
  0x7f   : > { %2878 = vmatprep.subr.bf16.mxu0 %v3113_v8  ;;  %3016 = vmatprep.subr.bf16.mxu1 %v3113_v8 }
  0x82   : > { %2879 = vmatpush3.bf16.msra.mxu0 %v3113_v8  ;;  %3024 = vmatpush3.bf16.msra.mxu1 %v3113_v8 }
  0x83   : > { %2880 = vmatprep.subr.bf16.mxu0 %v3114_v9  ;;  %3017 = vmatprep.subr.bf16.mxu1 %v3114_v9 }
  0x86   : > { %2881 = vmatpush3.bf16.msra.mxu0 %v3114_v9  ;;  %3025 = vmatpush3.bf16.msra.mxu1 %v3114_v9 }
  0x87   : > { %2914 = vmatprep.subr.bf16.mxu1 %v3131_v24 }
  0x89   : > { %2883 = vmatmul.mubr.bf16.vlgmr.msra.gmra.mxu0 %v3116_v10  ;;  %2899 = vmatmul.mubr.bf16.vlgmr.msra.gmra.mxu1 %v3124_v11 }
  0x8a   : > { %2886 = vmatprep.mubr.bf16.mxu0 %v3117_v12  ;;  %2902 = vmatprep.mubr.bf16.mxu1 %v3125_v13 }
  0x8b   : > { %2915 = vmatpush3.bf16.msra.mxu1 %v3131_v24 }
  0x8c   : > { %2916 = vmatprep.subr.bf16.mxu1 %v3132_v25 }
  0x8f   : > { %2917 = vmatpush3.bf16.msra.mxu1 %v3132_v25 }
  0x90   : > { %2918 = vmatprep.subr.bf16.mxu1 %v3133_v26 }
  0x91   : > { %2887 = vmatmul.mubr.bf16.gmra.mxu0 %v3118_v14  ;;  %2903 = vmatmul.mubr.bf16.gmra.mxu1 %v3126_v15 }
  0x92   : > { %2890 = vmatprep.mubr.bf16.mxu0 %v3119_v16  ;;  %2906 = vmatprep.mubr.bf16.mxu1 %v3127_v17 }
  0x93   : > { %2919 = vmatpush3.bf16.msra.mxu1 %v3133_v26 }
  0x94   : > { %2920 = vmatprep.subr.bf16.mxu1 %v3134_v27 }
  0x97   : > { %2921 = vmatpush3.bf16.msra.mxu1 %v3134_v27 }
  0x98   : > { %2922 = vmatprep.subr.bf16.mxu1 %v3135_v28 }
  0x99   : > { %2891 = vmatmul.mubr.bf16.gmra.mxu0 %v3120_v18  ;;  %2907 = vmatmul.mubr.bf16.gmra.mxu1 %v3128_v19 }
  0x9a   : > { %2894 = vmatprep.mubr.bf16.mxu0 %v3121_v20  ;;  %2910 = vmatprep.mubr.bf16.mxu1 %v3129_v21 }
  0x9b   : > { %2923 = vmatpush3.bf16.msra.mxu1 %v3135_v28 }
  0x9c   : > { %2924 = vmatprep.subr.bf16.mxu1 %v3136_v29 }
  0x9f   : > { %2925 = vmatpush3.bf16.msra.mxu1 %v3136_v29 }
  0xa0   : > { %2926 = vmatprep.subr.bf16.mxu1 %v3137_v30 }
  0xa1   : > { %2895 = vmatmul.mubr.bf16.gmra.mxu0 %v3123_v22  ;;  %2911 = vmatmul.mubr.bf16.gmra.mxu1 %v3130_v23 }
  0xa3   : > { %2927 = vmatpush3.bf16.msra.mxu1 %v3137_v30 }
  0xa4   : > { %2928 = vmatprep.subr.bf16.mxu1 %v3138_v31 }
  0xa7   : > { %2929 = vmatpush3.bf16.msra.mxu1 %v3138_v31 }
 0x149   : > { %v2884_v33 = vpop.f32.mrf.mxu0  ;;  %v2900_v34 = vpop.f32.mrf.mxu1 }
 0x14a   : > { %v3894_v35 = vadd.f32 %v2884_v33, %v3891_v32  ;;  %v3915_v53 = vadd.f32 %v2900_v34, %v3891_v32 }
 0x14b   : > { %v631_v36 = vpop.f32.mrf.mxu0  ;;  %v695_v37 = vpop.f32.mrf.mxu1 }
 0x14c   : > { %v2546_v38 = vmul.f32 -1.442695, %v3894_v35  ;;  %v3898_v39 = vadd.f32 %v3891_v32, %v631_v36  ;;  %v3924_v58 = vadd.f32 %v3891_v32, %v695_v37  ;;  %v2562_v63 = vmul.f32 -1.442695, %v3915_v53 }
 0x14d   : > { %v2885_v40 = vpop.f32.mrf.mxu0  ;;  %v2901_v41 = vpop.f32.mrf.mxu1 }
 0x14e   : > { %3147 = vpow2.f32 %v2546_v38  ;;  %v2544_v42 = vmul.f32 -1.442695, %v3898_v39  ;;  %v3902_v43 = vadd.f32 %v2885_v40, %v3891_v32  ;;  %v2560_v3 = vmul.f32 -1.442695, %v3924_v58 }
 0x14f   : > { %v634_v44 = vpop.f32.mrf.mxu0  ;;  %v698_v45 = vpop.f32.mrf.mxu1  ;;  %v3956_v21 = vadd.f32 %v2901_v41, %v3891_v32 }
 0x150   : > { %3149 = vpow2.f32 %v2544_v42  ;;  %v2547_v46 = vmul.f32 -1.442695, %v3902_v43  ;;  %v3906_v47 = vadd.f32 %v3891_v32, %v634_v44  ;;  %v3947_v14 = vadd.f32 %v3891_v32, %v698_v45 }
 0x151   : > { %v2888_v48 = vpop.f32.mrf.mxu0  ;;  %v3908_v49 = vpop.f32.mrf.mxu1  ;;  %v2563_v34 = vmul.f32 -1.442695, %v3956_v21 }
 0x152   : > { %3151 = vpow2.f32 %v2547_v46  ;;  %v2545_v50 = vmul.f32 -1.442695, %v3906_v47  ;;  %v3912_v51 = vadd.f32 %v2888_v48, %v3891_v32  ;;  %v2561_v29 = vmul.f32 -1.442695, %v3947_v14 }
 0x153   : > { %v647_v52 = vpop.f32.mrf.mxu0  ;;  %v3917_v54 = vpop.f32.mrf.mxu1 }
 0x154   : > { %3153 = vpow2.f32 %v2545_v50  ;;  %v2550_v55 = vmul.f32 -1.442695, %v3912_v51  ;;  %v3921_v56 = vadd.f32 %v3891_v32, %v647_v52  ;;  %v3981_v52 = vadd.f32 %v3891_v32, %v3917_v54 }
 0x155   : > { %v2889_v57 = vpop.f32.mrf.mxu0  ;;  %v3930_v61 = vpop.f32.mrf.mxu1 }
 0x156   : > { %3155 = vpow2.f32 %v2550_v55  ;;  %v2548_v59 = vmul.f32 -1.442695, %v3921_v56  ;;  %v3928_v60 = vadd.f32 %v2889_v57, %v3891_v32 }
 0x157   : > { %v650_v62 = vpop.f32.mrf.mxu0  ;;  %v714_v6 = vpop.f32.mrf.mxu1 }
 0x158   : > { %3157 = vpow2.f32 %v2548_v59  ;;  %v2551_v0 = vmul.f32 -1.442695, %v3928_v60  ;;  %v3935_v1 = vadd.f32 %v3891_v32, %v650_v62  ;;  %v3984_v59 = vadd.f32 %v3891_v32, %v714_v6 }
 0x159   : > { %v2892_v2 = vpop.f32.mrf.mxu0  ;;  %v3953_v18 = vpop.f32.mrf.mxu1 }
 0x15a   : > { %3159 = vpow2.f32 %v2551_v0  ;;  %v2549_v4 = vmul.f32 -1.442695, %v3935_v1  ;;  %v3940_v5 = vadd.f32 %v2892_v2, %v3891_v32  ;;  %v2565_v6 = vmul.f32 -1.442695, %v3984_v59 }
 0x15b   : > { %v3148_v7 = vpop.eup %3147  ;;  %v663_v8 = vpop.f32.mrf.mxu0  ;;  %3161 = vpow2.f32 %v2562_v63 }
 0x15c   : > { %v856_v9 = vadd.f32 1.0, %v3148_v7  ;;  %3163 = vpow2.f32 %v2549_v4  ;;  %v2554_v10 = vmul.f32 -1.442695, %v3940_v5  ;;  %v3944_v11 = vadd.f32 %v3891_v32, %v663_v8  ;;  %v3964_v30 = vpop.f32.mrf.mxu1 }
 0x15d   : > { %v3150_v12 = vpop.eup %3149  ;;  %v2893_v13 = vpop.f32.mrf.mxu0  ;;  %3165 = vpow2.f32 %v2560_v3  ;;  %v2564_v8 = vmul.f32 -1.442695, %v3981_v52 }
 0x15e   : > { %3167 = vrcp.f32 %v856_v9  ;;  %v854_v15 = vadd.f32 1.0, %v3150_v12  ;;  %v2552_v16 = vmul.f32 -1.442695, %v3944_v11  ;;  %v3951_v17 = vadd.f32 %v2893_v13, %v3891_v32  ;;  %v3976_v45 = vpop.f32.mrf.mxu1 }
 0x15f   : > { %v3152_v19 = vpop.eup %3151  ;;  %3169 = vpow2.f32 %v2554_v10  ;;  %v666_v20 = vpop.f32.mrf.mxu0 }
 0x160   : > { %3171 = vrcp.f32 %v854_v15  ;;  %v857_v22 = vadd.f32 1.0, %v3152_v19  ;;  %v2555_v23 = vmul.f32 -1.442695, %v3951_v17  ;;  %v3960_v24 = vadd.f32 %v3891_v32, %v666_v20  ;;  %v730_v54 = vpop.f32.mrf.mxu1 }
 0x161   : > { %v3154_v25 = vpop.eup %3153  ;;  %3173 = vpow2.f32 %v2552_v16  ;;  %v2896_v26 = vpop.f32.mrf.mxu0  ;;  %v3996_v15 = vadd.f32 %v3908_v49, %v3891_v32 }
 0x162   : > { %3175 = vrcp.f32 %v857_v22  ;;  %v855_v27 = vadd.f32 1.0, %v3154_v25  ;;  %v2553_v28 = vmul.f32 -1.442695, %v3960_v24  ;;  %v3971_v40 = vadd.f32 %v2896_v26, %v3891_v32  ;;  %v3998_v16 = vpop.f32.mrf.mxu1 }
 0x163   : > { %v3156_v31 = vpop.eup %3155  ;;  %3177 = vpow2.f32 %v2555_v23  ;;  %v679_v33 = vpop.f32.mrf.mxu0  ;;  %v4002_v22 = vadd.f32 %v3930_v61, %v3891_v32 }
 0x164   : > { %3179 = vrcp.f32 %v855_v27  ;;  %v860_v36 = vadd.f32 1.0, %v3156_v31  ;;  %v3968_v37 = vadd.f32 %v3891_v32, %v679_v33  ;;  %v2558_v63 = vmul.f32 -1.442695, %v3971_v40 }
 0x165   : > { %v3158_v38 = vpop.eup %3157  ;;  %3181 = vpow2.f32 %v2553_v28  ;;  %v2897_v41 = vpop.f32.mrf.mxu0  ;;  %v2566_v33 = vmul.f32 -1.442695, %v3996_v15 }
 0x166   : > { %v858_v42 = vadd.f32 1.0, %v3158_v38  ;;  %v3974_v44 = vadd.f32 %v2897_v41, %v3891_v32  ;;  %3183 = vpow2.f32 %v2561_v29  ;;  %v2556_v48 = vmul.f32 -1.442695, %v3968_v37 }
 0x167   : > { %v3160_v46 = vpop.eup %3159  ;;  %3185 = vpow2.f32 %v2563_v34  ;;  %v682_v50 = vpop.f32.mrf.mxu0  ;;  %v2567_v41 = vmul.f32 -1.442695, %v4002_v22 }
 0x168   : > { %v3162_v55 = vpop.eup %3161  ;;  %3187 = vrcp.f32 %v860_v36  ;;  %v861_v57 = vadd.f32 1.0, %v3160_v46  ;;  %v2559_v3 = vmul.f32 -1.442695, %v3974_v44  ;;  %v3989_v4 = vadd.f32 %v3891_v32, %v682_v50  ;;  %v743_v34 = vpop.f32.mrf.mxu1 }
 0x169   : > { %v3164_v62 = vpop.eup %3163  ;;  %3189 = vrcp.f32 %v858_v42 }
 0x16a   : > { %v3166_v0 = vpop.eup %3165  ;;  %3191 = vrcp.f32 %v861_v57  ;;  %v859_v2 = vadd.f32 1.0, %v3164_v62  ;;  %v2557_v13 = vmul.f32 -1.442695, %v3989_v4 }
 0x16b   : > { %v3168_v7 = vpop.eup %3167  ;;  %3193 = vpow2.f32 %v2556_v48  ;;  %v870_v50 = vadd.f32 1.0, %v3166_v0 }
 0x16c   : > { %v3170_v9 = vpop.eup %3169  ;;  %3195 = vrcp.f32 %v859_v2  ;;  %v952_v61 = vmul.f32 %v3168_v7, %v3894_v35  ;;  %v4018_v35 = vadd.f32 %v3891_v32, %v3964_v30 }
 0x16d   : > { %v3172_v10 = vpop.eup %3171  ;;  %3197 = vpow2.f32 %v2558_v63  ;;  %v864_v25 = vadd.f32 1.0, %v3170_v9  ;;  %v2913_v63 = vpop.f32.mrf.mxu1 }
 0x16e   : > { %v3174_v12 = vpop.eup %3173  ;;  %3199 = vpow2.f32 %v2559_v3  ;;  %v950_v49 = vmul.f32 %v3172_v10, %v3898_v39  ;;  %v4014_v39 = vadd.f32 %v3953_v18, %v3891_v32  ;;  %v4022_v18 = vadd.f32 %v3976_v45, %v3891_v32 }
 0x16f   : > { %v3176_v19 = vpop.eup %3175  ;;  %v862_v20 = vadd.f32 1.0, %v3174_v12  ;;  %3201 = vpow2.f32 %v2564_v8  ;;  %v4026_v3 = vadd.f32 %v3891_v32, %v730_v54  ;;  %v2568_v9 = vmul.f32 -1.442695, %v4018_v35  ;;  %v746_v12 = vpop.f32.mrf.mxu1 }
 0x170   : > { %v3178_v23 = vpop.eup %3177  ;;  %3203 = vpow2.f32 %v2565_v6  ;;  %v953_v27 = vmul.f32 %v3176_v19, %v3902_v43  ;;  %v872_v43 = vadd.f32 1.0, %v3162_v55  ;;  %v2570_v0 = vmul.f32 -1.442695, %v4014_v39 }
 0x171   : > { %v3180_v26 = vpop.eup %3179  ;;  %3205 = vrcp.f32 %v862_v20  ;;  %v865_v28 = vadd.f32 1.0, %v3178_v23  ;;  %v2571_v54 = vmul.f32 -1.442695, %v4022_v18  ;;  %v4035_v20 = vadd.f32 %v3891_v32, %v743_v34 }
 0x172   : > { %v3182_v29 = vpop.eup %3181  ;;  %v951_v31 = vmul.f32 %v3180_v26, %v3906_v47  ;;  %3207 = vpow2.f32 %v2557_v13  ;;  %v983_v48 = vpack.c.bf16 %v953_v27, %v952_v61  ;;  %v2569_v26 = vmul.f32 -1.442695, %v4026_v3 }
 0x173   : > { %v3184_v36 = vpop.eup %3183  ;;  %3209 = vrcp.f32 %v865_v28  ;;  %v863_v38 = vadd.f32 1.0, %v3182_v29  ;;  %v4039_v28 = vadd.f32 %v3891_v32, %v746_v12 }
 0x174   : > { %v4010_v42 = vpop.eup %3185  ;;  %3211 = vrcp.f32 %v864_v25  ;;  %v982_v46 = vpack.c.bf16 %v951_v31, %v950_v49  ;;  %v871_v62 = vadd.f32 1.0, %v3184_v36  ;;  %v2572_v49 = vmul.f32 -1.442695, %v4035_v20 }
 0x175   : > { %v3188_v47 = vpop.eup %3187  ;;  %3213 = vrcp.f32 %v863_v38  ;;  %v4044_v36 = vadd.f32 %v3998_v16, %v3891_v32  ;;  %v4047_v38 = vadd.f32 %v2913_v63, %v3891_v32  ;;  %v873_v16 = vadd.f32 1.0, %v4010_v42 }
 0x176   : > { %v3190_v57 = vpop.eup %3189  ;;  %3215 = vpow2.f32 %v2566_v33  ;;  %2930 = vmatprep.mubr.bf16.mxu1 %v982_v46  ;;  %v956_v19 = vmul.f32 %v3188_v47, %v3912_v51 }
 0x177   : > { %v3192_v2 = vpop.eup %3191  ;;  %3217 = vpow2.f32 %v2567_v41  ;;  %2931 = vmatmul.mubr.bf16.vlgmr.msra.gmra.mxu1 %v983_v48  ;;  %v954_v10 = vmul.f32 %v3190_v57, %v3921_v56  ;;  %v2573_v41 = vmul.f32 -1.442695, %v4039_v28  ;;  %v2574_v32 = vmul.f32 -1.442695, %v4044_v36 }
 0x178   : > { %v3194_v55 = vpop.eup %3193  ;;  %3219 = vrcp.f32 %v872_v43  ;;  %v957_v7 = vmul.f32 %v3192_v2, %v3928_v60 }
 0x179   : > { %v3196_v30 = vpop.eup %3195  ;;  %v866_v8 = vadd.f32 1.0, %v3194_v55  ;;  %3221 = vrcp.f32 %v870_v50  ;;  %v2575_v55 = vmul.f32 -1.442695, %v4047_v38 }
 0x17a   : > { %v3198_v6 = vpop.eup %3197  ;;  %v955_v45 = vmul.f32 %v3196_v30, %v3935_v1  ;;  %3223 = vrcp.f32 %v871_v62  ;;  %v985_v1 = vpack.c.bf16 %v957_v7, %v956_v19 }
 0x17b   : > { %v3200_v13 = vpop.eup %3199  ;;  %3225 = vrcp.f32 %v866_v8  ;;  %v868_v27 = vadd.f32 1.0, %v3198_v6 }
 0x17c   : > { %v3202_v60 = vpop.eup %3201  ;;  %v869_v23 = vadd.f32 1.0, %v3200_v13  ;;  %3227 = vpow2.f32 %v2570_v0  ;;  %v984_v25 = vpack.c.bf16 %v955_v45, %v954_v10 }
 0x17d   : > { %v3204_v56 = vpop.eup %3203  ;;  %3229 = vpow2.f32 %v2568_v9  ;;  %v874_v34 = vadd.f32 1.0, %v3202_v60 }
 0x17e   : > { %v3206_v51 = vpop.eup %3205  ;;  %3231 = vrcp.f32 %v869_v23  ;;  %2934 = vmatprep.mubr.bf16.mxu1 %v984_v25  ;;  %v875_v47 = vadd.f32 1.0, %v3204_v56 }
 0x17f   : > { %v3208_v29 = vpop.eup %3207  ;;  %3233 = vpow2.f32 %v2571_v54  ;;  %2935 = vmatmul.mubr.bf16.gmra.mxu1 %v985_v1  ;;  %v958_v50 = vmul.f32 %v3206_v51, %v3944_v11 }
 0x180   : > { %v3210_v31 = vpop.eup %3209  ;;  %v867_v33 = vadd.f32 1.0, %v3208_v29  ;;  %3235 = vpow2.f32 %v2569_v26 }
 0x181   : > { %v3212_v61 = vpop.eup %3211  ;;  %3237 = vrcp.f32 %v868_v27  ;;  %v961_v46 = vmul.f32 %v3210_v31, %v3951_v17 }
 0x182   : > { %v3214_v43 = vpop.eup %3213  ;;  %3239 = vrcp.f32 %v867_v33  ;;  %v960_v2 = vmul.f32 %v3212_v61, %v3940_v5 }
 0x183   : > { %v3216_v48 = vpop.eup %3215  ;;  %v959_v57 = vmul.f32 %v3214_v43, %v3960_v24  ;;  %3241 = vpow2.f32 %v2572_v49 }
 0x184   : > { %v3218_v62 = vpop.eup %3217  ;;  %3243 = vrcp.f32 %v874_v34  ;;  %v987_v30 = vpack.c.bf16 %v961_v46, %v960_v2  ;;  %v876_v42 = vadd.f32 1.0, %v3216_v48 }
 0x185   : > { %v3220_v63 = vpop.eup %3219  ;;  %v986_v17 = vpack.c.bf16 %v959_v57, %v958_v50  ;;  %3245 = vpow2.f32 %v2573_v41  ;;  %v877_v5 = vadd.f32 1.0, %v3218_v62 }
 0x186   : > { %v3222_v0 = vpop.eup %3221  ;;  %3247 = vrcp.f32 %v875_v47 }
 0x187   : > { %v3224_v11 = vpop.eup %3223  ;;  %3249 = vrcp.f32 %v873_v16  ;;  %2938 = vmatprep.mubr.bf16.mxu1 %v986_v17  ;;  %v966_v54 = vmul.f32 %v3222_v0, %v3924_v58 }
 0x188   : > { %v3226_v24 = vpop.eup %3225  ;;  %3251 = vpow2.f32 %v2574_v32  ;;  %2939 = vmatmul.mubr.bf16.gmra.mxu1 %v987_v30  ;;  %v967_v23 = vmul.f32 %v3224_v11, %v3947_v14 }
 0x189   : > { %v3228_v7 = vpop.eup %3227  ;;  %3253 = vpow2.f32 %v2575_v55  ;;  %v962_v56 = vmul.f32 %v3226_v24, %v3968_v37 }
 0x18a   : > { %v3230_v8 = vpop.eup %3229  ;;  %3255 = vrcp.f32 %v876_v42  ;;  %v880_v25 = vadd.f32 1.0, %v3228_v7  ;;  %v990_v14 = vpack.c.bf16 %v967_v23, %v966_v54 }
 0x18b   : > { %v3232_v9 = vpop.eup %3231  ;;  %v878_v6 = vadd.f32 1.0, %v3230_v8  ;;  %3257 = vrcp.f32 %v877_v5 }
 0x18c   : > { %v3234_v10 = vpop.eup %3233  ;;  %v965_v60 = vmul.f32 %v3232_v9, %v3974_v44 }
 0x18d   : > { %v3236_v45 = vpop.eup %3235  ;;  %3259 = vrcp.f32 %v878_v6  ;;  %v881_v1 = vadd.f32 1.0, %v3234_v10  ;;  %v3143_v10 = vld [vmem:[#allocation8 + $0x18] sm:$0xff]  }
 0x18e   : > { %v3238_v12 = vpop.eup %3237  ;;  %v879_v13 = vadd.f32 1.0, %v3236_v45  ;;  %v3146_v45 = vld [vmem:[#allocation8] sm:$0xff]  }
 0x18f   : > { %v3240_v19 = vpop.eup %3239  ;;  %v964_v29 = vmul.f32 %v3238_v12, %v3971_v40  ;;  %v968_v40 = vmul.f32 %v3220_v63, %v3915_v53  ;;  %v4080_v12 = vld [vmem:[%s4768_s4] ss:$0 sm:$0xff] }
 0x190   : > { %v3242_v26 = vpop.eup %3241  ;;  %v963_v27 = vmul.f32 %v3240_v19, %v3989_v4  ;;  %3261 = vrcp.f32 %v879_v13 }
 0x191   : > { %v3244_v51 = vpop.eup %3243  ;;  %v882_v49 = vadd.f32 1.0, %v3242_v26  ;;  %3263 = vrcp.f32 %v880_v25  ;;  %v989_v44 = vpack.c.bf16 %v965_v60, %v964_v29 }
 0x192   : > { %v3246_v31 = vpop.eup %3245  ;;  %v988_v33 = vpack.c.bf16 %v963_v27, %v962_v56  ;;  %3265 = vrcp.f32 %v881_v1  ;;  %v970_v4 = vmul.f32 %v3244_v51, %v3981_v52 }
 0x193   : > { %v3248_v34 = vpop.eup %3247  ;;  %v883_v58 = vadd.f32 1.0, %v3246_v31  ;;  %3267 = vrcp.f32 %v882_v49 }
 0x194   : > { %v3250_v61 = vpop.eup %3249  ;;  %2942 = vmatprep.mubr.bf16.mxu1 %v988_v33  ;;  %v971_v43 = vmul.f32 %v3248_v34, %v3984_v59 }
 0x195   : > { %v3252_v41 = vpop.eup %3251  ;;  %2943 = vmatmul.mubr.bf16.gmra.mxu1 %v989_v44  ;;  %3269 = vrcp.f32 %v883_v58  ;;  %v969_v46 = vmul.f32 %v3250_v61, %v3956_v21 }
 0x196   : > { %v3254_v37 = vpop.eup %3253  ;;  %2946 = vmatprep.mubr.bf16.mxu1 %v990_v14  ;;  %v884_v47 = vadd.f32 1.0, %v3252_v41  ;;  %v992_v16 = vpack.c.bf16 %v971_v43, %v970_v4 }
 0x197   : > { %v3256_v48 = vpop.eup %3255  ;;  %v885_v50 = vadd.f32 1.0, %v3254_v37  ;;  %v991_v2 = vpack.c.bf16 %v969_v46, %v968_v40 }
 0x198   : > { %v3258_v57 = vpop.eup %3257  ;;  %3271 = vrcp.f32 %v884_v47  ;;  %v972_v55 = vmul.f32 %v3256_v48, %v3996_v15 }
 0x199   : > { %v973_v52 = vmul.f32 %v3258_v57, %v4002_v22  ;;  %3273 = vrcp.f32 %v885_v50 }
 0x19a   : > { %v3260_v62 = vpop.eup %3259 }
 0x19b   : > { %v974_v59 = vmul.f32 %v3260_v62, %v4018_v35  ;;  %v993_v17 = vpack.c.bf16 %v973_v52, %v972_v55 }
 0x19d   : > { %v3262_v32 = vpop.eup %3261  ;;  %2947 = vmatmul.mubr.bf16.gmra.mxu1 %v991_v2 }
 0x19e   : > { %v975_v53 = vmul.f32 %v3262_v32, %v4026_v3  ;;  %2950 = vmatprep.mubr.bf16.mxu1 %v992_v16  ;;  %v3264_v21 = vpop.eup %3263 }
 0x19f   : > { %v3266_v63 = vpop.eup %3265  ;;  %v976_v24 = vmul.f32 %v3264_v21, %v4014_v39  ;;  %v3139_v39 = vld [vmem:[#allocation8 + $0x38] sm:$0xff]  }
 0x1a0   : > { %v3268_v0 = vpop.eup %3267  ;;  %v994_v30 = vpack.c.bf16 %v975_v53, %v974_v59  ;;  %v977_v42 = vmul.f32 %v3266_v63, %v4022_v18  ;;  %2962 = vmatprep.subr.bf16.mxu0 %v3139_v39  ;;  %v3140_v18 = vld [vmem:[#allocation8 + $0x30] sm:$0xff]  }
 0x1a1   : > { %v978_v15 = vmul.f32 %v3268_v0, %v4035_v20  ;;  %2963 = vmatpush3.bf16.msra.mxu0 %v3139_v39  ;;  %v3141_v20 = vld [vmem:[#allocation8 + $0x28] sm:$0xff]  }
 0x1a2   : > { %v3270_v11 = vpop.eup %3269  ;;  %v995_v7 = vpack.c.bf16 %v977_v42, %v976_v24  ;;  %2964 = vmatprep.subr.bf16.mxu0 %v3140_v18 }
 0x1a3   : > { %v979_v22 = vmul.f32 %v3270_v11, %v4039_v28  ;;  %v3142_v28 = vld [vmem:[#allocation8 + $0x20] sm:$0xff]  }
 0x1a5   : > { %2951 = vmatmul.mubr.bf16.gmra.mxu1 %v993_v17  ;;  %v3272_v35 = vpop.eup %3271  ;;  %v996_v5 = vpack.c.bf16 %v979_v22, %v978_v15  ;;  %2965 = vmatpush3.bf16.msra.mxu0 %v3140_v18 }
 0x1a6   : > { %2954 = vmatprep.mubr.bf16.mxu1 %v994_v30  ;;  %v3274_v3 = vpop.eup %3273  ;;  %v980_v8 = vmul.f32 %v3272_v35, %v4044_v36  ;;  %2966 = vmatprep.subr.bf16.mxu0 %v3141_v20  ;;  %v3144_v36 = vld [vmem:[#allocation8 + $0x10] sm:$0xff]  }
 0x1a7   : > { %v981_v9 = vmul.f32 %v3274_v3, %v4047_v38  ;;  %v3145_v38 = vld [vmem:[#allocation8 + $0x8] sm:$0xff]  }
 0x1a9   : > { %v997_v6 = vpack.c.bf16 %v981_v9, %v980_v8  ;;  %2967 = vmatpush3.bf16.msra.mxu0 %v3141_v20 }
 0x1aa   : > { %2968 = vmatprep.subr.bf16.mxu0 %v3142_v28 }
 0x1ad   : > { %2955 = vmatmul.mubr.bf16.gmra.mxu1 %v995_v7  ;;  %2969 = vmatpush3.bf16.msra.mxu0 %v3142_v28 }
 0x1ae   : > { %2958 = vmatprep.mubr.bf16.mxu1 %v996_v5  ;;  %2970 = vmatprep.subr.bf16.mxu0 %v3143_v10 }
 0x1b1   : > { %2971 = vmatpush3.bf16.msra.mxu0 %v3143_v10 }
 0x1b2   : > { %2972 = vmatprep.subr.bf16.mxu0 %v3144_v36 }
 0x1b5   : > { %2959 = vmatmul.mubr.bf16.gmra.mxu1 %v997_v6  ;;  %2973 = vmatpush3.bf16.msra.mxu0 %v3144_v36 }
 0x1b6   : > { %2974 = vmatprep.subr.bf16.mxu0 %v3145_v38 }
 0x1b9   : > { %2975 = vmatpush3.bf16.msra.mxu0 %v3145_v38 }
 0x1ba   : > { %2976 = vmatprep.subr.bf16.mxu0 %v3146_v45 }
 0x1bd   : > { %2977 = vmatpush3.bf16.msra.mxu0 %v3146_v45 }
 0x237   : > { %v2932_v13 = vpop.f32.mrf.mxu1 }
 0x238   : > { %v4083_v19 = vadd.f32 %v2932_v13, %v4080_v12 }
 0x239   : > { %v1103_v54 = vpop.f32.mrf.mxu1 }
 0x23a   : > { %v2587_v60 = vmul.f32 -1.442695, %v4083_v19  ;;  %v4087_v23 = vadd.f32 %v4080_v12, %v1103_v54 }
 0x23b   : > { %v2933_v25 = vpop.f32.mrf.mxu1 }
 0x23c   : > { %3275 = vpow2.f32 %v2587_v60  ;;  %v2585_v26 = vmul.f32 -1.442695, %v4087_v23  ;;  %v4091_v56 = vadd.f32 %v2933_v25, %v4080_v12 }
 0x23d   : > { %v1106_v27 = vpop.f32.mrf.mxu1 }
 0x23e   : > { %3277 = vpow2.f32 %v2585_v26  ;;  %v2588_v1 = vmul.f32 -1.442695, %v4091_v56  ;;  %v4095_v51 = vadd.f32 %v4080_v12, %v1106_v27 }
 0x23f   : > { %v2936_v29 = vpop.f32.mrf.mxu1 }
 0x240   : > { %3279 = vpow2.f32 %v2588_v1  ;;  %v2586_v49 = vmul.f32 -1.442695, %v4095_v51  ;;  %v4099_v31 = vadd.f32 %v2936_v29, %v4080_v12 }
 0x241   : > { %v1119_v33 = vpop.f32.mrf.mxu1 }
 0x242   : > { %3281 = vpow2.f32 %v2586_v49  ;;  %v2591_v34 = vmul.f32 -1.442695, %v4099_v31  ;;  %v4103_v58 = vadd.f32 %v4080_v12, %v1119_v33 }
 0x243   : > { %v2937_v44 = vpop.f32.mrf.mxu1 }
 0x244   : > { %3283 = vpow2.f32 %v2591_v34  ;;  %v2589_v61 = vmul.f32 -1.442695, %v4103_v58  ;;  %v4107_v14 = vadd.f32 %v2937_v44, %v4080_v12 }
 0x245   : > { %v1122_v41 = vpop.f32.mrf.mxu1 }
 0x246   : > { %3285 = vpow2.f32 %v2589_v61  ;;  %v2592_v37 = vmul.f32 -1.442695, %v4107_v14  ;;  %v4111_v4 = vadd.f32 %v4080_v12, %v1122_v41 }
 0x248   : > { %3287 = vpow2.f32 %v2592_v37  ;;  %v2590_v43 = vmul.f32 -1.442695, %v4111_v4  ;;  %v2940_v40 = vpop.f32.mrf.mxu1 }
 0x249   : > { %v3276_v46 = vpop.eup %3275  ;;  %v4115_v47 = vadd.f32 %v2940_v40, %v4080_v12 }
 0x24a   : > { %v1328_v48 = vadd.f32 1.0, %v3276_v46  ;;  %3289 = vpow2.f32 %v2590_v43  ;;  %v1135_v50 = vpop.f32.mrf.mxu1 }
 0x24b   : > { %v3278_v57 = vpop.eup %3277  ;;  %v2595_v16 = vmul.f32 -1.442695, %v4115_v47  ;;  %v4119_v62 = vadd.f32 %v4080_v12, %v1135_v50 }
 0x24c   : > { %3291 = vrcp.f32 %v1328_v48  ;;  %v1326_v2 = vadd.f32 1.0, %v3278_v57  ;;  %v2941_v32 = vpop.f32.mrf.mxu1 }
 0x24d   : > { %v3280_v55 = vpop.eup %3279  ;;  %3293 = vpow2.f32 %v2595_v16  ;;  %v2593_v52 = vmul.f32 -1.442695, %v4119_v62  ;;  %v4123_v59 = vadd.f32 %v2941_v32, %v4080_v12 }
 0x24e   : > { %3295 = vrcp.f32 %v1326_v2  ;;  %v1329_v53 = vadd.f32 1.0, %v3280_v55  ;;  %v1138_v21 = vpop.f32.mrf.mxu1 }
 0x24f   : > { %v3282_v63 = vpop.eup %3281  ;;  %3297 = vpow2.f32 %v2593_v52  ;;  %v2596_v17 = vmul.f32 -1.442695, %v4123_v59  ;;  %v4127_v0 = vadd.f32 %v4080_v12, %v1138_v21 }
 0x250   : > { %3299 = vrcp.f32 %v1329_v53  ;;  %v1327_v30 = vadd.f32 1.0, %v3282_v63 }
 0x251   : > { %v3284_v11 = vpop.eup %3283  ;;  %3301 = vpow2.f32 %v2596_v17  ;;  %v2594_v24 = vmul.f32 -1.442695, %v4127_v0 }
 0x252   : > { %3303 = vrcp.f32 %v1327_v30  ;;  %v1332_v15 = vadd.f32 1.0, %v3284_v11 }
 0x253   : > { %v3286_v42 = vpop.eup %3285  ;;  %3305 = vpow2.f32 %v2594_v24 }
 0x254   : > { %v1330_v35 = vadd.f32 1.0, %v3286_v42  ;;  %3307 = vrcp.f32 %v1332_v15 }
 0x255   : > { %v3288_v22 = vpop.eup %3287  ;;  %v2944_v7 = vpop.f32.mrf.mxu1 }
 0x256   : > { %v1333_v3 = vadd.f32 1.0, %v3288_v22  ;;  %v4131_v5 = vadd.f32 %v2944_v7, %v4080_v12 }
 0x257   : > { %v3290_v8 = vpop.eup %3289  ;;  %v1151_v9 = vpop.f32.mrf.mxu1 }
 0x258   : > { %3309 = vrcp.f32 %v1333_v3  ;;  %v1331_v6 = vadd.f32 1.0, %v3290_v8  ;;  %v2599_v39 = vmul.f32 -1.442695, %v4131_v5  ;;  %v4135_v18 = vadd.f32 %v4080_v12, %v1151_v9 }
 0x259   : > { %v3292_v20 = vpop.eup %3291  ;;  %3311 = vrcp.f32 %v1330_v35  ;;  %v2945_v28 = vpop.f32.mrf.mxu1 }
 0x25a   : > { %v3294_v10 = vpop.eup %3293  ;;  %3313 = vrcp.f32 %v1331_v6  ;;  %v2597_v36 = vmul.f32 -1.442695, %v4135_v18  ;;  %v4139_v38 = vadd.f32 %v2945_v28, %v4080_v12  ;;  %v1424_v50 = vmul.f32 %v3292_v20, %v4083_v19 }
 0x25b   : > { %v3296_v45 = vpop.eup %3295  ;;  %v1336_v13 = vadd.f32 1.0, %v3294_v10  ;;  %3315 = vpow2.f32 %v2599_v39  ;;  %v1154_v54 = vpop.f32.mrf.mxu1 }
 0x25c   : > { %v3298_v60 = vpop.eup %3297  ;;  %3317 = vpow2.f32 %v2597_v36  ;;  %v2600_v25 = vmul.f32 -1.442695, %v4139_v38  ;;  %v4143_v26 = vadd.f32 %v4080_v12, %v1154_v54  ;;  %v1422_v40 = vmul.f32 %v3296_v45, %v4087_v23 }
 0x25d   : > { %v3300_v27 = vpop.eup %3299  ;;  %3319 = vrcp.f32 %v1336_v13  ;;  %v1334_v1 = vadd.f32 1.0, %v3298_v60  ;;  %v2948_v29 = vpop.f32.mrf.mxu1 }
 0x25e   : > { %v3302_v49 = vpop.eup %3301  ;;  %3321 = vpow2.f32 %v2600_v25  ;;  %v2598_v33 = vmul.f32 -1.442695, %v4143_v26  ;;  %v4147_v34 = vadd.f32 %v2948_v29, %v4080_v12  ;;  %v1425_v61 = vmul.f32 %v3300_v27, %v4091_v56 }
 0x25f   : > { %v3304_v44 = vpop.eup %3303  ;;  %3323 = vrcp.f32 %v1334_v1  ;;  %v1337_v41 = vadd.f32 1.0, %v3302_v49  ;;  %v1167_v37 = vpop.f32.mrf.mxu1 }
 0x260   : > { %v3306_v43 = vpop.eup %3305  ;;  %v1423_v46 = vmul.f32 %v3304_v44, %v4095_v51  ;;  %3325 = vpow2.f32 %v2598_v33  ;;  %v2603_v48 = vmul.f32 -1.442695, %v4147_v34  ;;  %v4155_v16 = vadd.f32 %v4080_v12, %v1167_v37 }
 0x261   : > { %3327 = vrcp.f32 %v1337_v41  ;;  %v1335_v57 = vadd.f32 1.0, %v3306_v43  ;;  %v2949_v2 = vpop.f32.mrf.mxu1  ;;  %v1455_v55 = vpack.c.bf16 %v1425_v61, %v1424_v50  ;;  %v3308_v52 = vpop.eup %3307 }
 0x262   : > { %3329 = vpow2.f32 %v2603_v48  ;;  %v4158_v56 = vadd.f32 %v2949_v2, %v4080_v12  ;;  %v1454_v32 = vpack.c.bf16 %v1423_v46, %v1422_v40  ;;  %v2601_v23 = vmul.f32 -1.442695, %v4155_v16 }
 0x263   : > { %3331 = vrcp.f32 %v1335_v57  ;;  %v1170_v51 = vpop.f32.mrf.mxu1  ;;  %v1428_v9 = vmul.f32 %v3308_v52, %v4099_v31 }
 0x264   : > { %v2604_v53 = vmul.f32 -1.442695, %v4158_v56  ;;  %v4163_v19 = vadd.f32 %v4080_v12, %v1170_v51  ;;  %2978 = vmatprep.mubr.bf16.mxu0 %v1454_v32  ;;  %3333 = vpow2.f32 %v2601_v23 }
 0x265   : > { %v3310_v21 = vpop.eup %3309  ;;  %v2952_v63 = vpop.f32.mrf.mxu1  ;;  %2979 = vmatmul.mubr.bf16.vlgmr.msra.gmra.mxu0 %v1455_v55 }
 0x266   : > { %v3312_v17 = vpop.eup %3311  ;;  %3335 = vpow2.f32 %v2604_v53  ;;  %v2602_v30 = vmul.f32 -1.442695, %v4163_v19  ;;  %v4167_v11 = vadd.f32 %v2952_v63, %v4080_v12  ;;  %v1429_v42 = vmul.f32 %v3310_v21, %v4107_v14 }
 0x267   : > { %v3314_v24 = vpop.eup %3313  ;;  %v1183_v15 = vpop.f32.mrf.mxu1  ;;  %v1426_v6 = vmul.f32 %v3312_v17, %v4103_v58 }
 0x268   : > { %v3316_v22 = vpop.eup %3315  ;;  %v1427_v35 = vmul.f32 %v3314_v24, %v4111_v4  ;;  %3337 = vpow2.f32 %v2602_v30  ;;  %v2607_v7 = vmul.f32 -1.442695, %v4167_v11  ;;  %v4173_v3 = vadd.f32 %v4080_v12, %v1183_v15 }
 0x269   : > { %v3318_v8 = vpop.eup %3317  ;;  %v1340_v39 = vadd.f32 1.0, %v3316_v22  ;;  %v2953_v20 = vpop.f32.mrf.mxu1  ;;  %v1457_v54 = vpack.c.bf16 %v1429_v42, %v1428_v9 }
 0x26a   : > { %v3320_v28 = vpop.eup %3319  ;;  %v1338_v10 = vadd.f32 1.0, %v3318_v8  ;;  %3339 = vpow2.f32 %v2607_v7  ;;  %v2605_v14 = vmul.f32 -1.442695, %v4173_v3  ;;  %v4179_v4 = vadd.f32 %v2953_v20, %v4080_v12 }
 0x26b   : > { %v3322_v36 = vpop.eup %3321  ;;  %3341 = vrcp.f32 %v1340_v39  ;;  %v1186_v45 = vpop.f32.mrf.mxu1  ;;  %v1456_v13 = vpack.c.bf16 %v1427_v35, %v1426_v6  ;;  %v1432_v50 = vmul.f32 %v3320_v28, %v4115_v47 }
 0x26c   : > { %v3324_v60 = vpop.eup %3323  ;;  %3343 = vrcp.f32 %v1338_v10  ;;  %v1341_v31 = vadd.f32 1.0, %v3322_v36  ;;  %v2608_v58 = vmul.f32 -1.442695, %v4179_v4  ;;  %v4183_v25 = vadd.f32 %v4080_v12, %v1186_v45 }
 0x26d   : > { %v3326_v27 = vpop.eup %3325  ;;  %3345 = vpow2.f32 %v2605_v14  ;;  %v2956_v1 = vpop.f32.mrf.mxu1  ;;  %2982 = vmatprep.mubr.bf16.mxu0 %v1456_v13  ;;  %v1430_v57 = vmul.f32 %v3324_v60, %v4119_v62 }
 0x26e   : > { %v3328_v29 = vpop.eup %3327  ;;  %3347 = vrcp.f32 %v1341_v31  ;;  %v1339_v49 = vadd.f32 1.0, %v3326_v27  ;;  %v2606_v33 = vmul.f32 -1.442695, %v4183_v25  ;;  %v4187_v44 = vadd.f32 %v2956_v1, %v4080_v12  ;;  %2983 = vmatmul.mubr.bf16.gmra.mxu0 %v1457_v54 }
 0x26f   : > { %v3330_v61 = vpop.eup %3329  ;;  %v1433_v41 = vmul.f32 %v3328_v29, %v4123_v59  ;;  %3349 = vpow2.f32 %v2608_v58  ;;  %v1199_v37 = vpop.f32.mrf.mxu1 }
 0x270   : > { %v3332_v43 = vpop.eup %3331  ;;  %3351 = vrcp.f32 %v1339_v49  ;;  %v1344_v40 = vadd.f32 1.0, %v3330_v61  ;;  %v2611_v46 = vmul.f32 -1.442695, %v4187_v44  ;;  %v4192_v48 = vadd.f32 %v4080_v12, %v1199_v37 }
 0x271   : > { %v1431_v2 = vmul.f32 %v3332_v43, %v4127_v0  ;;  %3353 = vpow2.f32 %v2606_v33  ;;  %v2957_v32 = vpop.f32.mrf.mxu1  ;;  %v3334_v55 = vpop.eup %3333  ;;  %v1459_v63 = vpack.c.bf16 %v1433_v41, %v1432_v50 }
 0x272   : > { %3355 = vrcp.f32 %v1344_v40  ;;  %v2609_v59 = vmul.f32 -1.442695, %v4192_v48  ;;  %v4199_v23 = vadd.f32 %v2957_v32, %v4080_v12  ;;  %v1342_v52 = vadd.f32 1.0, %v3334_v55 }
 0x273   : > { %v3336_v51 = vpop.eup %3335  ;;  %3357 = vpow2.f32 %v2611_v46  ;;  %v1202_v53 = vpop.f32.mrf.mxu1  ;;  %v1458_v21 = vpack.c.bf16 %v1431_v2, %v1430_v57 }
 0x274   : > { %v1345_v47 = vadd.f32 1.0, %v3336_v51  ;;  %3359 = vpow2.f32 %v2609_v59  ;;  %v2612_v62 = vmul.f32 -1.442695, %v4199_v23  ;;  %v4203_v0 = vadd.f32 %v4080_v12, %v1202_v53 }
 0x275   : > { %v3338_v17 = vpop.eup %3337  ;;  %3361 = vrcp.f32 %v1342_v52  ;;  %v2960_v30 = vpop.f32.mrf.mxu1  ;;  %2986 = vmatprep.mubr.bf16.mxu0 %v1458_v21 }
 0x276   : > { %3363 = vrcp.f32 %v1345_v47  ;;  %v1343_v24 = vadd.f32 1.0, %v3338_v17  ;;  %v2610_v42 = vmul.f32 -1.442695, %v4203_v0  ;;  %v4207_v15 = vadd.f32 %v2960_v30, %v4080_v12  ;;  %2987 = vmatmul.mubr.bf16.gmra.mxu0 %v1459_v63 }
 0x277   : > { %v3340_v22 = vpop.eup %3339  ;;  %3365 = vpow2.f32 %v2612_v62  ;;  %v1215_v35 = vpop.f32.mrf.mxu1 }
 0x278   : > { %v3342_v7 = vpop.eup %3341  ;;  %3367 = vrcp.f32 %v1343_v24  ;;  %v1348_v8 = vadd.f32 1.0, %v3340_v22  ;;  %v2615_v9 = vmul.f32 -1.442695, %v4207_v15  ;;  %v4211_v6 = vadd.f32 %v4080_v12, %v1215_v35 }
 0x279   : > { %v3344_v39 = vpop.eup %3343  ;;  %3369 = vpow2.f32 %v2610_v42  ;;  %v2961_v20 = vpop.f32.mrf.mxu1  ;;  %v1436_v37 = vmul.f32 %v3342_v7, %v4131_v5 }
 0x27a   : > { %v3346_v28 = vpop.eup %3345  ;;  %3371 = vrcp.f32 %v1348_v8  ;;  %v2613_v10 = vmul.f32 -1.442695, %v4211_v6  ;;  %v4215_v14 = vadd.f32 %v2961_v20, %v4080_v12  ;;  %v1434_v49 = vmul.f32 %v3344_v39, %v4135_v18 }
 0x27b   : > { %v3348_v36 = vpop.eup %3347  ;;  %v1346_v45 = vadd.f32 1.0, %v3346_v28  ;;  %3373 = vpow2.f32 %v2615_v9  ;;  %v1218_v13 = vpop.f32.mrf.mxu1 }
 0x27c   : > { %v3350_v54 = vpop.eup %3349  ;;  %3375 = vpow2.f32 %v2613_v10  ;;  %v2616_v60 = vmul.f32 -1.442695, %v4215_v14  ;;  %v4219_v31 = vadd.f32 %v4080_v12, %v1218_v13  ;;  %v1437_v27 = vmul.f32 %v3348_v36, %v4139_v38 }
 0x27d   : > { %v3352_v58 = vpop.eup %3351  ;;  %3377 = vrcp.f32 %v1346_v45  ;;  %v1349_v1 = vadd.f32 1.0, %v3350_v54 }
 0x27e   : > { %v3354_v29 = vpop.eup %3353  ;;  %v1435_v33 = vmul.f32 %v3352_v58, %v4143_v26  ;;  %3379 = vpow2.f32 %v2616_v60  ;;  %v2614_v61 = vmul.f32 -1.442695, %v4219_v31  ;;  %v1461_v38 = vpack.c.bf16 %v1437_v27, %v1436_v37 }
 0x27f   : > { %v3356_v41 = vpop.eup %3355  ;;  %3381 = vrcp.f32 %v1349_v1  ;;  %v1347_v43 = vadd.f32 1.0, %v3354_v29 }
 0x280   : > { %v3358_v12 = vpop.eup %3357  ;;  %3383 = vpow2.f32 %v2614_v61  ;;  %v1460_v40 = vpack.c.bf16 %v1435_v33, %v1434_v49  ;;  %v1440_v21 = vmul.f32 %v3356_v41, %v4147_v34 }
 0x281   : > { %v3360_v46 = vpop.eup %3359  ;;  %3385 = vrcp.f32 %v1347_v43  ;;  %v1352_v2 = vadd.f32 1.0, %v3358_v12 }
 0x282   : > { %v3362_v50 = vpop.eup %3361  ;;  %v1350_v57 = vadd.f32 1.0, %v3360_v46  ;;  %2990 = vmatprep.mubr.bf16.mxu0 %v1460_v40 }
 0x283   : > { %v3364_v18 = vpop.eup %3363  ;;  %2991 = vmatmul.mubr.bf16.gmra.mxu0 %v1461_v38  ;;  %v1438_v51 = vmul.f32 %v3362_v50, %v4155_v16 }
 0x284   : > { %v3366_v26 = vpop.eup %3365  ;;  %v1441_v55 = vmul.f32 %v3364_v18, %v4158_v56  ;;  %3387 = vrcp.f32 %v1350_v57 }
 0x285   : > { %v3368_v32 = vpop.eup %3367  ;;  %v1353_v59 = vadd.f32 1.0, %v3366_v26 }
 0x286   : > { %v3370_v5 = vpop.eup %3369  ;;  %v1439_v52 = vmul.f32 %v3368_v32, %v4163_v19  ;;  %v1463_v30 = vpack.c.bf16 %v1441_v55, %v1440_v21 }
 0x287   : > { %v3372_v53 = vpop.eup %3371  ;;  %3389 = vrcp.f32 %v1353_v59  ;;  %v1351_v63 = vadd.f32 1.0, %v3370_v5 }
 0x288   : > { %v3374_v47 = vpop.eup %3373  ;;  %3391 = vrcp.f32 %v1352_v2  ;;  %v1462_v62 = vpack.c.bf16 %v1439_v52, %v1438_v51  ;;  %v1444_v20 = vmul.f32 %v3372_v53, %v4167_v11 }
 0x289   : > { %v3376_v17 = vpop.eup %3375  ;;  %3393 = vrcp.f32 %v1351_v63  ;;  %v1356_v22 = vadd.f32 1.0, %v3374_v47 }
 0x28a   : > { %v3378_v24 = vpop.eup %3377  ;;  %v1354_v56 = vadd.f32 1.0, %v3376_v17  ;;  %2994 = vmatprep.mubr.bf16.mxu0 %v1462_v62 }
 0x28b   : > { %v3380_v42 = vpop.eup %3379  ;;  %2995 = vmatmul.mubr.bf16.gmra.mxu0 %v1463_v30  ;;  %v1442_v9 = vmul.f32 %v3378_v24, %v4173_v3 }
 0x28c   : > { %v3382_v16 = vpop.eup %3381  ;;  %v1357_v19 = vadd.f32 1.0, %v3380_v42  ;;  %3395 = vrcp.f32 %v1354_v56 }
 0x28d   : > { %v3384_v35 = vpop.eup %3383  ;;  %v1445_v34 = vmul.f32 %v3382_v16, %v4179_v4 }
 0x28e   : > { %v3386_v7 = vpop.eup %3385  ;;  %3397 = vrcp.f32 %v1357_v19  ;;  %v1355_v8 = vadd.f32 1.0, %v3384_v35 }
 0x28f   : > { %v1443_v39 = vmul.f32 %v3386_v7, %v4183_v25  ;;  %3399 = vrcp.f32 %v1356_v22  ;;  %v1465_v10 = vpack.c.bf16 %v1445_v34, %v1444_v20 }
 0x290   : > { %3401 = vrcp.f32 %v1355_v8 }
 0x291   : > { %v1464_v28 = vpack.c.bf16 %v1443_v39, %v1442_v9  ;;  %v3388_v36 = vpop.eup %3387 }
 0x292   : > { %v1446_v60 = vmul.f32 %v3388_v36, %v4192_v48 }
 0x293   : > { %2998 = vmatprep.mubr.bf16.mxu0 %v1464_v28 }
 0x294   : > { %v3390_v45 = vpop.eup %3389  ;;  %2999 = vmatmul.mubr.bf16.gmra.mxu0 %v1465_v10 }
 0x295   : > { %v3392_v13 = vpop.eup %3391  ;;  %v1449_v4 = vmul.f32 %v3390_v45, %v4199_v23 }
 0x296   : > { %v3394_v54 = vpop.eup %3393  ;;  %v1448_v25 = vmul.f32 %v3392_v13, %v4187_v44  ;;  %v4245_v44 = vld [vmem:[%s4770_s6] ss:$0 sm:$0xff] }
 0x297   : > { %v1447_v3 = vmul.f32 %v3394_v54, %v4203_v0 }
 0x298   : > { %v1467_v11 = vpack.c.bf16 %v1449_v4, %v1448_v25 }
 0x299   : > { %v1466_v58 = vpack.c.bf16 %v1447_v3, %v1446_v60  ;;  %v3396_v27 = vpop.eup %3395 }
 0x29a   : > { %v1450_v33 = vmul.f32 %v3396_v27, %v4211_v6 }
 0x29b   : > { %v3398_v1 = vpop.eup %3397  ;;  %3002 = vmatprep.mubr.bf16.mxu0 %v1466_v58 }
 0x29c   : > { %v3400_v29 = vpop.eup %3399  ;;  %3003 = vmatmul.mubr.bf16.gmra.mxu0 %v1467_v11  ;;  %v1453_v61 = vmul.f32 %v3398_v1, %v4215_v14 }
 0x29d   : > { %v3402_v49 = vpop.eup %3401  ;;  %v1452_v48 = vmul.f32 %v3400_v29, %v4207_v15 }
 0x29e   : > { %v1451_v23 = vmul.f32 %v3402_v49, %v4219_v31 }
 0x29f   : > { %v1469_v0 = vpack.c.bf16 %v1453_v61, %v1452_v48 }
 0x2a0   : > { %v1468_v41 = vpack.c.bf16 %v1451_v23, %v1450_v33 }
 0x2a2   : > { %3006 = vmatprep.mubr.bf16.mxu0 %v1468_v41 }
 0x2a4   : > { %3007 = vmatmul.mubr.bf16.gmra.mxu0 %v1469_v0 }
 0x325   : > { %v2980_v37 = vpop.f32.mrf.mxu0 }
 0x326   : > { %v4248_v43 = vadd.f32 %v2980_v37, %v4245_v44 }
 0x327   : > { %v1575_v6 = vpop.f32.mrf.mxu0 }
 0x328   : > { %v4251_v14 = vadd.f32 %v4245_v44, %v1575_v6  ;;  %1706 = vadd.xlane.f32.xlu1 %v4248_v43  ;;  %v1800_v40 = vmul.f32 %v4248_v43, %v4248_v43 }
 0x329   : > { %v2981_v15 = vpop.f32.mrf.mxu0 }
 0x32a   : > { %v4255_v31 = vadd.f32 %v2981_v15, %v4245_v44  ;;  %1702 = vadd.xlane.f32.xlu0 %v4251_v14  ;;  %v1798_v18 = vmul.f32 %v4251_v14, %v4251_v14 }
 0x32b   : > { %v1578_v12 = vpop.f32.mrf.mxu0 }
 0x32c   : > { %1708 = vadd.xlane.f32.xlu1 %v4255_v31  ;;  %v4262_v46 = vadd.f32 %v4245_v44, %v1578_v12  ;;  %v1801_v50 = vmul.f32 %v4255_v31, %v4255_v31 }
 0x32e   : > { %v2984_v38 = vpop.f32.mrf.mxu0  ;;  %1834 = vadd.xlane.f32.xlu0 %v1800_v40  ;;  %v1799_v26 = vmul.f32 %v4262_v46, %v4262_v46 }
 0x32f   : > { %v4275_v59 = vadd.f32 %v2984_v38, %v4245_v44 }
 0x330   : > { %v1591_v57 = vpop.f32.mrf.mxu0  ;;  %1836 = vadd.xlane.f32.xlu1 %v1801_v50 }
 0x331   : > { %v4283_v52 = vadd.f32 %v4245_v44, %v1591_v57  ;;  %v1804_v63 = vmul.f32 %v4275_v59, %v4275_v59 }
 0x332   : > { %1830 = vadd.xlane.f32.xlu0 %v1798_v18  ;;  %v2985_v2 = vpop.f32.mrf.mxu0 }
 0x333   : > { %v4271_v32 = vadd.f32 %v2985_v2, %v4245_v44  ;;  %v1802_v17 = vmul.f32 %v4283_v52, %v4283_v52 }
 0x334   : > { %1832 = vadd.xlane.f32.xlu1 %v1799_v26  ;;  %v1594_v55 = vpop.f32.mrf.mxu0 }
 0x335   : > { %v4279_v5 = vadd.f32 %v4245_v44, %v1594_v55  ;;  %v1805_v53 = vmul.f32 %v4271_v32, %v4271_v32 }
 0x336   : > { %1704 = vadd.xlane.f32.xlu0 %v4262_v46  ;;  %v2988_v51 = vpop.f32.mrf.mxu0 }
 0x337   : > { %v1803_v47 = vmul.f32 %v4279_v5, %v4279_v5  ;;  %v4299_v56 = vadd.f32 %v2988_v51, %v4245_v44 }
 0x338   : > { %1716 = vadd.xlane.f32.xlu1 %v4271_v32  ;;  %v1607_v21 = vpop.f32.mrf.mxu0 }
 0x339   : > { %v4307_v16 = vadd.f32 %v4245_v44, %v1607_v21  ;;  %v1808_v7 = vmul.f32 %v4299_v56, %v4299_v56 }
 0x33a   : > { %1714 = vadd.xlane.f32.xlu0 %v4275_v59  ;;  %v2989_v62 = vpop.f32.mrf.mxu0 }
 0x33b   : > { %v4296_v30 = vadd.f32 %v2989_v62, %v4245_v44  ;;  %v1806_v9 = vmul.f32 %v4307_v16, %v4307_v16 }
 0x33c   : > { %1712 = vadd.xlane.f32.xlu1 %v4279_v5  ;;  %v1610_v24 = vpop.f32.mrf.mxu0 }
 0x33d   : > { %v4303_v42 = vadd.f32 %v4245_v44, %v1610_v24  ;;  %v1809_v19 = vmul.f32 %v4296_v30, %v4296_v30 }
 0x33e   : > { %1710 = vadd.xlane.f32.xlu0 %v4283_v52 }
 0x33f   : > { %v1807_v34 = vmul.f32 %v4303_v42, %v4303_v42 }
 0x340   : > { %1844 = vadd.xlane.f32.xlu1 %v1805_v53 }
 0x342   : > { %1842 = vadd.xlane.f32.xlu0 %v1804_v63 }
 0x343   : > { %v2992_v22 = vpop.f32.mrf.mxu0 }
 0x344   : > { %1840 = vadd.xlane.f32.xlu1 %v1803_v47  ;;  %v4323_v28 = vadd.f32 %v2992_v22, %v4245_v44 }
 0x345   : > { %v1623_v35 = vpop.f32.mrf.mxu0 }
 0x346   : > { %1838 = vadd.xlane.f32.xlu0 %v1802_v17  ;;  %v4331_v45 = vadd.f32 %v4245_v44, %v1623_v35  ;;  %v1812_v4 = vmul.f32 %v4323_v28, %v4323_v28 }
 0x347   : > { %v2993_v8 = vpop.f32.mrf.mxu0 }
 0x348   : > { %1724 = vadd.xlane.f32.xlu1 %v4296_v30  ;;  %v4320_v39 = vadd.f32 %v2993_v8, %v4245_v44  ;;  %v1810_v25 = vmul.f32 %v4331_v45, %v4331_v45 }
 0x349   : > { %v1626_v20 = vpop.f32.mrf.mxu0 }
 0x34a   : > { %1722 = vadd.xlane.f32.xlu0 %v4299_v56  ;;  %v4327_v10 = vadd.f32 %v4245_v44, %v1626_v20  ;;  %v1813_v13 = vmul.f32 %v4320_v39, %v4320_v39 }
 0x34b   : > { %v2996_v36 = vpop.f32.mrf.mxu0 }
 0x34c   : > { %1720 = vadd.xlane.f32.xlu1 %v4303_v42  ;;  %v1811_v60 = vmul.f32 %v4327_v10, %v4327_v10  ;;  %v4347_v11 = vadd.f32 %v2996_v36, %v4245_v44 }
 0x34d   : > { %v1639_v54 = vpop.f32.mrf.mxu0 }
 0x34e   : > { %1718 = vadd.xlane.f32.xlu0 %v4307_v16  ;;  %v4355_v49 = vadd.f32 %v4245_v44, %v1639_v54  ;;  %v1816_v23 = vmul.f32 %v4347_v11, %v4347_v11 }
 0x34f   : > { %v2997_v3 = vpop.f32.mrf.mxu0 }
 0x350   : > { %1852 = vadd.xlane.f32.xlu1 %v1809_v19  ;;  %v4344_v58 = vadd.f32 %v2997_v3, %v4245_v44  ;;  %v1814_v0 = vmul.f32 %v4355_v49, %v4355_v49 }
 0x351   : > { %v1642_v27 = vpop.f32.mrf.mxu0 }
 0x352   : > { %1850 = vadd.xlane.f32.xlu0 %v1808_v7  ;;  %v4351_v1 = vadd.f32 %v4245_v44, %v1642_v27  ;;  %v1817_v33 = vmul.f32 %v4344_v58, %v4344_v58 }
 0x354   : > { %1848 = vadd.xlane.f32.xlu1 %v1807_v34  ;;  %v3000_v29 = vpop.f32.mrf.mxu0  ;;  %v1815_v48 = vmul.f32 %v4351_v1, %v4351_v1 }
 0x355   : > { %v4371_v15 = vadd.f32 %v3000_v29, %v4245_v44 }
 0x356   : > { %1846 = vadd.xlane.f32.xlu0 %v1806_v9  ;;  %v1655_v61 = vpop.f32.mrf.mxu0 }
 0x357   : > { %v4379_v38 = vadd.f32 %v4245_v44, %v1655_v61  ;;  %v1820_v18 = vmul.f32 %v4371_v15, %v4371_v15 }
 0x358   : > { %1732 = vadd.xlane.f32.xlu1 %v4320_v39  ;;  %v3001_v41 = vpop.f32.mrf.mxu0 }
 0x359   : > { %v4368_v37 = vadd.f32 %v3001_v41, %v4245_v44  ;;  %v1818_v55 = vmul.f32 %v4379_v38, %v4379_v38 }
 0x35a   : > { %1730 = vadd.xlane.f32.xlu0 %v4323_v28  ;;  %v1658_v6 = vpop.f32.mrf.mxu0 }
 0x35b   : > { %v4375_v12 = vadd.f32 %v4245_v44, %v1658_v6  ;;  %v1821_v50 = vmul.f32 %v4368_v37, %v4368_v37 }
 0x35c   : > { %1728 = vadd.xlane.f32.xlu1 %v4327_v10  ;;  %v3004_v40 = vpop.f32.mrf.mxu0 }
 0x35d   : > { %v1819_v26 = vmul.f32 %v4375_v12, %v4375_v12  ;;  %v4395_v21 = vadd.f32 %v3004_v40, %v4245_v44 }
 0x35e   : > { %1726 = vadd.xlane.f32.xlu0 %v4331_v45  ;;  %v1671_v57 = vpop.f32.mrf.mxu0 }
 0x35f   : > { %v4403_v62 = vadd.f32 %v4245_v44, %v1671_v57  ;;  %v1824_v22 = vmul.f32 %v4395_v21, %v4395_v21 }
 0x360   : > { %1860 = vadd.xlane.f32.xlu1 %v1813_v13  ;;  %v3005_v2 = vpop.f32.mrf.mxu0 }
 0x361   : > { %v4392_v51 = vadd.f32 %v3005_v2, %v4245_v44  ;;  %v1822_v7 = vmul.f32 %v4403_v62, %v4403_v62 }
 0x362   : > { %1858 = vadd.xlane.f32.xlu0 %v1812_v4  ;;  %v1674_v53 = vpop.f32.mrf.mxu0 }
 0x363   : > { %v4399_v63 = vadd.f32 %v4245_v44, %v1674_v53  ;;  %v1825_v17 = vmul.f32 %v4392_v51, %v4392_v51 }
 0x364   : > { %1856 = vadd.xlane.f32.xlu1 %v1811_v60  ;;  %v3008_v47 = vpop.f32.mrf.mxu0 }
 0x365   : > { %v1823_v19 = vmul.f32 %v4399_v63, %v4399_v63  ;;  %v4419_v9 = vadd.f32 %v3008_v47, %v4245_v44 }
 0x366   : > { %1854 = vadd.xlane.f32.xlu0 %v1810_v25  ;;  %v1687_v24 = vpop.f32.mrf.mxu0 }
 0x367   : > { %v4427_v36 = vadd.f32 %v4245_v44, %v1687_v24 }
 0x368   : > { %1740 = vadd.xlane.f32.xlu1 %v4344_v58  ;;  %v3009_v35 = vpop.f32.mrf.mxu0 }
 0x369   : > { %v4416_v34 = vadd.f32 %v3009_v35, %v4245_v44  ;;  %v1826_v54 = vmul.f32 %v4427_v36, %v4427_v36 }
 0x36a   : > { %1738 = vadd.xlane.f32.xlu0 %v4347_v11  ;;  %v1690_v8 = vpop.f32.mrf.mxu0 }
 0x36b   : > { %v4423_v20 = vadd.f32 %v4245_v44, %v1690_v8  ;;  %v1829_v4 = vmul.f32 %v4416_v34, %v4416_v34  ;;  %v1828_v44 = vmul.f32 %v4419_v9, %v4419_v9 }
 0x36c   : > { %1736 = vadd.xlane.f32.xlu1 %v4351_v1 }
 0x36d   : > { %v1827_v13 = vmul.f32 %v4423_v20, %v4423_v20 }
 0x36e   : > { %1734 = vadd.xlane.f32.xlu0 %v4355_v49 }
 0x370   : > { %1868 = vadd.xlane.f32.xlu1 %v1817_v33 }
 0x372   : > { %1866 = vadd.xlane.f32.xlu0 %v1816_v23 }
 0x374   : > { %1864 = vadd.xlane.f32.xlu1 %v1815_v48 }
 0x376   : > { %1862 = vadd.xlane.f32.xlu0 %v1814_v0 }
 0x378   : > { %1748 = vadd.xlane.f32.xlu1 %v4368_v37 }
 0x37a   : > { %1746 = vadd.xlane.f32.xlu0 %v4371_v15 }
 0x37c   : > { %1744 = vadd.xlane.f32.xlu1 %v4375_v12 }
 0x37e   : > { %1742 = vadd.xlane.f32.xlu0 %v4379_v38 }
 0x380   : > { %1876 = vadd.xlane.f32.xlu1 %v1821_v50 }
 0x382   : > { %1874 = vadd.xlane.f32.xlu0 %v1820_v18 }
 0x384   : > { %1872 = vadd.xlane.f32.xlu1 %v1819_v26 }
 0x386   : > { %1870 = vadd.xlane.f32.xlu0 %v1818_v55 }
 0x388   : > { %1756 = vadd.xlane.f32.xlu1 %v4392_v51 }
 0x38a   : > { %1754 = vadd.xlane.f32.xlu0 %v4395_v21 }
 0x38c   : > { %1752 = vadd.xlane.f32.xlu1 %v4399_v63 }
 0x38e   : > { %1750 = vadd.xlane.f32.xlu0 %v4403_v62 }
 0x390   : > { %1884 = vadd.xlane.f32.xlu1 %v1825_v17 }
 0x392   : > { %1882 = vadd.xlane.f32.xlu0 %v1824_v22 }
 0x394   : > { %1880 = vadd.xlane.f32.xlu1 %v1823_v19 }
 0x396   : > { %1878 = vadd.xlane.f32.xlu0 %v1822_v7 }
 0x398   : > { %1764 = vadd.xlane.f32.xlu1 %v4416_v34 }
 0x39a   : > { %1762 = vadd.xlane.f32.xlu0 %v4419_v9 }
 0x39c   : > { %1760 = vadd.xlane.f32.xlu1 %v4423_v20 }
 0x39e   : > { %1758 = vadd.xlane.f32.xlu0 %v4427_v36 }
 0x3a0   : > { %1888 = vadd.xlane.f32.xlu1 %v1827_v13 }
 0x3a2   : > { %1886 = vadd.xlane.f32.xlu0 %v1826_v54 }
 0x3a4   : > { %1892 = vadd.xlane.f32.xlu1 %v1829_v4 }
 0x3a6   : > { %1890 = vadd.xlane.f32.xlu0 %v1828_v44 }
 0x3b1   : > { %v1707_v60 = vpop.xlane.xlu1 %1706 }
 0x3b2   : > { %v1768_v25 = vmul.f32 0.0078125, %v1707_v60 }
 0x3b3   : > { %v1703_v3 = vpop.xlane.xlu0 %1702 }
 0x3b4   : > { %v1928_v61 = vmul.f32 %v1768_v25, %v1768_v25  ;;  %v4439_v23 = vmul.f32 0.0078125, %v1703_v3 }
 0x3b5   : > { %v1709_v27 = vpop.xlane.xlu1 %1708 }
 0x3b6   : > { %v1769_v29 = vmul.f32 0.0078125, %v1709_v27  ;;  %v1926_v57 = vmul.f32 %v4439_v23, %v4439_v23 }
 0x3b7   : > { %v1835_v33 = vpop.xlane.xlu0 %1834 }
 0x3b8   : > { %v1896_v48 = vmul.f32 0.0078125, %v1835_v33  ;;  %v1929_v0 = vmul.f32 %v1769_v29, %v1769_v29 }
 0x3b9   : > { %v1837_v41 = vpop.xlane.xlu1 %1836 }
 0x3ba   : > { %v1960_v6 = vsub.f32 %v1896_v48, %v1928_v61  ;;  %v1897_v40 = vmul.f32 0.0078125, %v1837_v41 }
 0x3bb   : > { %v1831_v50 = vpop.xlane.xlu0 %1830 }
 0x3bc   : > { %v1992_v18 = vmax.f32 %v1960_v6, 0.0  ;;  %v1961_v26 = vsub.f32 %v1897_v40, %v1929_v0  ;;  %v1894_v2 = vmul.f32 0.0078125, %v1831_v50 }
 0x3bd   : > { %v1833_v55 = vpop.xlane.xlu1 %1832 }
 0x3be   : > { %v2024_v53 = vadd.f32 1e-05, %v1992_v18  ;;  %v1993_v47 = vmax.f32 %v1961_v26, 0.0  ;;  %v1958_v17 = vsub.f32 %v1894_v2, %v1926_v57  ;;  %v1895_v13 = vmul.f32 0.0078125, %v1833_v55 }
 0x3bf   : > { %v1705_v24 = vpop.xlane.xlu0 %1704  ;;  %v2088_v57 = vsub.f32 %v4248_v43, %v1768_v25 }
 0x3c0   : > { %3403 = vrsqrt.f32 %v2024_v53  ;;  %v2025_v22 = vadd.f32 1e-05, %v1993_v47  ;;  %v1990_v19 = vmax.f32 %v1958_v17, 0.0  ;;  %v4443_v35 = vmul.f32 0.0078125, %v1705_v24  ;;  %v4462_v47 = vld [vmem:[%s4771_s7] ss:$0 sm:$0xff] }
 0x3c1   : > { %v1717_v7 = vpop.xlane.xlu1 %1716  ;;  %v2089_v53 = vsub.f32 %v4255_v31, %v1769_v29 }
 0x3c2   : > { %3405 = vrsqrt.f32 %v2025_v22  ;;  %v2022_v8 = vadd.f32 1e-05, %v1990_v19  ;;  %v1927_v54 = vmul.f32 %v4443_v35, %v4443_v35  ;;  %v4447_v27 = vmul.f32 0.0078125, %v1717_v7 }
 0x3c3   : > { %v1715_v4 = vpop.xlane.xlu0 %1714 }
 0x3c4   : > { %3407 = vrsqrt.f32 %v2022_v8  ;;  %v1959_v44 = vsub.f32 %v1895_v13, %v1927_v54  ;;  %v4449_v48 = vmul.f32 0.0078125, %v1715_v4  ;;  %v1933_v0 = vmul.f32 %v4447_v27, %v4447_v27 }
 0x3c5   : > { %v1713_v60 = vpop.xlane.xlu1 %1712 }
 0x3c6   : > { %v1991_v3 = vmax.f32 %v1959_v44, 0.0  ;;  %v4453_v40 = vmul.f32 0.0078125, %v1713_v60  ;;  %v1932_v18 = vmul.f32 %v4449_v48, %v4449_v48  ;;  %v2086_v60 = vsub.f32 %v4251_v14, %v4439_v23 }
 0x3c7   : > { %v1711_v33 = vpop.xlane.xlu0 %1710 }
 0x3c8   : > { %v2023_v61 = vadd.f32 1e-05, %v1991_v3  ;;  %v4464_v17 = vmul.f32 0.0078125, %v1711_v33  ;;  %v1931_v8 = vmul.f32 %v4453_v40, %v4453_v40  ;;  %v4474_v3 = vld [vmem:[%s4772_s8] ss:$0 sm:$0xff] }
 0x3c9   : > { %v1845_v41 = vpop.xlane.xlu1 %1844 }
 0x3ca   : > { %3409 = vrsqrt.f32 %v2023_v61  ;;  %v1901_v6 = vmul.f32 0.0078125, %v1845_v41  ;;  %v1930_v33 = vmul.f32 %v4464_v17, %v4464_v17 }
 0x3cb   : > { %v1843_v50 = vpop.xlane.xlu0 %1842 }
 0x3cc   : > { %v1965_v26 = vsub.f32 %v1901_v6, %v1933_v0  ;;  %v1900_v2 = vmul.f32 0.0078125, %v1843_v50 }
 0x3cd   : > { %v3404_v55 = vpop.eup %3403  ;;  %v1841_v24 = vpop.xlane.xlu1 %1840 }
 0x3ce   : > { %v2120_v22 = vmul.f32 %v3404_v55, %v2088_v57  ;;  %v1997_v19 = vmax.f32 %v1965_v26, 0.0  ;;  %v1964_v7 = vsub.f32 %v1900_v2, %v1932_v18  ;;  %v1899_v43 = vmul.f32 0.0078125, %v1841_v24 }
 0x3cf   : > { %v3406_v25 = vpop.eup %3405  ;;  %v1839_v13 = vpop.xlane.xlu0 %1838 }
 0x3d0   : > { %v2159_v54 = vmul.f32 %v4462_v47, %v2120_v22  ;;  %v2121_v31 = vmul.f32 %v3406_v25, %v2089_v53  ;;  %v2029_v29 = vadd.f32 1e-05, %v1997_v19  ;;  %v1996_v4 = vmax.f32 %v1964_v7, 0.0 }
 0x3d1   : > { %v3408_v44 = vpop.eup %3407  ;;  %v1963_v61 = vsub.f32 %v1899_v43, %v1931_v8  ;;  %v1898_v41 = vmul.f32 0.0078125, %v1839_v13  ;;  %v1725_v0 = vpop.xlane.xlu1 %1724  ;;  %v2087_v19 = vsub.f32 %v4262_v46, %v4443_v35 }
 0x3d2   : > { %v2160_v6 = vmul.f32 %v4462_v47, %v2121_v31  ;;  %3411 = vrsqrt.f32 %v2029_v29  ;;  %v2118_v50 = vmul.f32 %v3408_v44, %v2086_v60  ;;  %v2028_v57 = vadd.f32 1e-05, %v1996_v4 }
 0x3d3   : > { %v1995_v18 = vmax.f32 %v1963_v61, 0.0  ;;  %v1962_v26 = vsub.f32 %v1898_v41, %v1930_v33  ;;  %v1723_v14 = vpop.xlane.xlu0 %1722  ;;  %v2198_v23 = vadd.f32 %v4474_v3, %v2159_v54  ;;  %v4483_v7 = vmul.f32 0.0078125, %v1725_v0 }
 0x3d4   : > { %v2199_v2 = vadd.f32 %v4474_v3, %v2160_v6  ;;  %3413 = vrsqrt.f32 %v2028_v57  ;;  %v2157_v25 = vmul.f32 %v4462_v47, %v2118_v50  ;;  %v4491_v31 = vmul.f32 0.0078125, %v1723_v14 }
 0x3d5   : > { %v2027_v55 = vadd.f32 1e-05, %v1995_v18  ;;  %v1994_v53 = vmax.f32 %v1962_v26, 0.0  ;;  %v1721_v24 = vpop.xlane.xlu1 %1720  ;;  %v1937_v4 = vmul.f32 %v4483_v7, %v4483_v7  ;;  %v2093_v50 = vsub.f32 %v4271_v32, %v4447_v27 }
 0x3d6   : > { %v2707_v22 = vpack.c.bf16 %v2199_v2, %v2198_v23  ;;  %v4493_v29 = vmul.f32 0.0078125, %v1721_v24  ;;  %v2196_v60 = vadd.f32 %v4474_v3, %v2157_v25  ;;  %v1936_v41 = vmul.f32 %v4491_v31, %v4491_v31 }
 0x3d7   : > { %v3410_v43 = vpop.eup %3409  ;;  %3415 = vrsqrt.f32 %v2027_v55  ;;  %v2026_v8 = vadd.f32 1e-05, %v1994_v53  ;;  %v1719_v13 = vpop.xlane.xlu0 %1718  ;;  %v2092_v32 = vsub.f32 %v4275_v59, %v4449_v48  ;;  %v2090_v48 = vsub.f32 %v4283_v52, %v4464_v17 }
 0x3d8   : > { %2779 = vst [vmem:[%s4488_s19 + $0x8] sm:$0xff] %v2707_v22   ;;  %v2119_v54 = vmul.f32 %v3410_v43, %v2087_v19  ;;  %v1935_v57 = vmul.f32 %v4493_v29, %v4493_v29  ;;  %v4506_v18 = vmul.f32 0.0078125, %v1719_v13 }
 0x3d9   : > { %3417 = vrsqrt.f32 %v2026_v8  ;;  %v1853_v46 = vpop.xlane.xlu1 %1852 }
 0x3da   : > { %v2158_v35 = vmul.f32 %v4462_v47, %v2119_v54  ;;  %v1905_v44 = vmul.f32 0.0078125, %v1853_v46  ;;  %v1934_v27 = vmul.f32 %v4506_v18, %v4506_v18 }
 0x3db   : > { %v1851_v33 = vpop.xlane.xlu0 %1850 }
 0x3dc   : > { %v2197_v61 = vadd.f32 %v4474_v3, %v2158_v35  ;;  %v1969_v0 = vsub.f32 %v1905_v44, %v1937_v4  ;;  %v1904_v6 = vmul.f32 0.0078125, %v1851_v33  ;;  %v2091_v44 = vsub.f32 %v4279_v5, %v4453_v40 }
 0x3dd   : > { %v1849_v26 = vpop.xlane.xlu1 %1848 }
 0x3de   : > { %v2702_v14 = vpack.c.bf16 %v2197_v61, %v2196_v60  ;;  %v2001_v23 = vmax.f32 %v1969_v0, 0.0  ;;  %v1968_v2 = vsub.f32 %v1904_v6, %v1936_v41  ;;  %v1903_v55 = vmul.f32 0.0078125, %v1849_v26 }
 0x3df   : > { %v3412_v53 = vpop.eup %3411  ;;  %v1847_v24 = vpop.xlane.xlu0 %1846 }
 0x3e0   : > { %2703 = vst [vmem:[%s4488_s19] sm:$0xff] %v2702_v14   ;;  %v2125_v22 = vmul.f32 %v3412_v53, %v2093_v50  ;;  %v2033_v19 = vadd.f32 1e-05, %v2001_v23  ;;  %v2000_v43 = vmax.f32 %v1968_v2, 0.0  ;;  %v1967_v25 = vsub.f32 %v1903_v55, %v1935_v57 }
 0x3e1   : > { %v1902_v8 = vmul.f32 0.0078125, %v1847_v24  ;;  %v1733_v13 = vpop.xlane.xlu1 %1732  ;;  %v3414_v54 = vpop.eup %3413 }
 0x3e2   : > { %v2164_v46 = vmul.f32 %v4462_v47, %v2125_v22  ;;  %3419 = vrsqrt.f32 %v2033_v19  ;;  %v2032_v35 = vadd.f32 1e-05, %v2000_v43  ;;  %v1999_v4 = vmax.f32 %v1967_v25, 0.0 }
 0x3e3   : > { %v2124_v60 = vmul.f32 %v3414_v54, %v2092_v32  ;;  %v1966_v33 = vsub.f32 %v1902_v8, %v1934_v27  ;;  %v1731_v61 = vpop.xlane.xlu0 %1730  ;;  %v4520_v5 = vmul.f32 0.0078125, %v1733_v13 }
 0x3e4   : > { %v3416_v41 = vpop.eup %3415  ;;  %3421 = vrsqrt.f32 %v2032_v35  ;;  %v2031_v59 = vadd.f32 1e-05, %v1999_v4  ;;  %v2203_v14 = vadd.f32 %v4474_v3, %v2164_v46  ;;  %v4524_v52 = vmul.f32 0.0078125, %v1731_v61 }
 0x3e5   : > { %v2163_v0 = vmul.f32 %v4462_v47, %v2124_v60  ;;  %v2123_v6 = vmul.f32 %v3416_v41, %v2091_v44  ;;  %v1998_v50 = vmax.f32 %v1966_v33, 0.0  ;;  %v1729_v57 = vpop.xlane.xlu1 %1728  ;;  %v1941_v32 = vmul.f32 %v4520_v5, %v4520_v5 }
 0x3e6   : > { %v3418_v26 = vpop.eup %3417  ;;  %3423 = vrsqrt.f32 %v2031_v59  ;;  %v4527_v19 = vmul.f32 0.0078125, %v1729_v57  ;;  %v1940_v13 = vmul.f32 %v4524_v52, %v4524_v52  ;;  %v2097_v60 = vsub.f32 %v4296_v30, %v4483_v7 }
 0x3e7   : > { %v2202_v40 = vadd.f32 %v4474_v3, %v2163_v0  ;;  %v2162_v23 = vmul.f32 %v4462_v47, %v2123_v6  ;;  %v2122_v2 = vmul.f32 %v3418_v26, %v2090_v48  ;;  %v2030_v55 = vadd.f32 1e-05, %v1998_v50  ;;  %v1727_v53 = vpop.xlane.xlu0 %1726 }
 0x3e8   : > { %v4536_v35 = vmul.f32 0.0078125, %v1727_v53  ;;  %v1939_v33 = vmul.f32 %v4527_v19, %v4527_v19  ;;  %v2096_v48 = vsub.f32 %v4299_v56, %v4491_v31  ;;  %v2095_v30 = vsub.f32 %v4303_v42, %v4493_v29 }
 0x3e9   : > { %v2717_v17 = vpack.c.bf16 %v2203_v14, %v2202_v40  ;;  %v2161_v24 = vmul.f32 %v4462_v47, %v2122_v2  ;;  %3425 = vrsqrt.f32 %v2030_v55  ;;  %v1861_v22 = vpop.xlane.xlu1 %1860  ;;  %v2201_v43 = vadd.f32 %v4474_v3, %v2162_v23 }
 0x3ea   : > { %v1909_v27 = vmul.f32 0.0078125, %v1861_v22  ;;  %v1938_v7 = vmul.f32 %v4536_v35, %v4536_v35  ;;  %v2094_v42 = vsub.f32 %v4307_v16, %v4506_v18 }
 0x3eb   : > { %2781 = vst [vmem:[%s4488_s19 + $0x18] sm:$0xff] %v2717_v17   ;;  %v2200_v25 = vadd.f32 %v4474_v3, %v2161_v24  ;;  %v1859_v8 = vpop.xlane.xlu0 %1858 }
 0x3ec   : > { %v1908_v54 = vmul.f32 0.0078125, %v1859_v8  ;;  %v1973_v4 = vsub.f32 %v1909_v27, %v1941_v32 }
 0x3ed   : > { %v2712_v46 = vpack.c.bf16 %v2201_v43, %v2200_v25  ;;  %v1857_v44 = vpop.xlane.xlu1 %1856 }
 0x3ee   : > { %v1972_v61 = vsub.f32 %v1908_v54, %v1940_v13  ;;  %v1907_v41 = vmul.f32 0.0078125, %v1857_v44  ;;  %v2005_v0 = vmax.f32 %v1973_v4, 0.0 }
 0x3ef   : > { %v3420_v59 = vpop.eup %3419  ;;  %2780 = vst [vmem:[%s4488_s19 + $0x10] sm:$0xff] %v2712_v46   ;;  %v1855_v6 = vpop.xlane.xlu0 %1854 }
 0x3f0   : > { %v2129_v50 = vmul.f32 %v3420_v59, %v2097_v60  ;;  %v2004_v57 = vmax.f32 %v1972_v61, 0.0  ;;  %v1971_v26 = vsub.f32 %v1907_v41, %v1939_v33  ;;  %v1906_v14 = vmul.f32 0.0078125, %v1855_v6 }
 0x3f1   : > { %v3422_v40 = vpop.eup %3421  ;;  %v2037_v23 = vadd.f32 1e-05, %v2005_v0  ;;  %v1741_v2 = vpop.xlane.xlu1 %1740 }
 0x3f2   : > { %v2168_v55 = vmul.f32 %v4462_v47, %v2129_v50  ;;  %v2128_v53 = vmul.f32 %v3422_v40, %v2096_v48  ;;  %v2036_v17 = vadd.f32 1e-05, %v2004_v57  ;;  %v2003_v56 = vmax.f32 %v1971_v26, 0.0 }
 0x3f3   : > { %v3424_v31 = vpop.eup %3423  ;;  %3427 = vrsqrt.f32 %v2037_v23  ;;  %v1970_v24 = vsub.f32 %v1906_v14, %v1938_v7  ;;  %v1739_v22 = vpop.xlane.xlu0 %1738  ;;  %v4555_v46 = vmul.f32 0.0078125, %v1741_v2 }
 0x3f4   : > { %v2167_v43 = vmul.f32 %v4462_v47, %v2128_v53  ;;  %v2127_v25 = vmul.f32 %v3424_v31, %v2095_v30  ;;  %3429 = vrsqrt.f32 %v2036_v17  ;;  %v2035_v29 = vadd.f32 1e-05, %v2003_v56 }
 0x3f5   : > { %v2002_v32 = vmax.f32 %v1970_v24, 0.0  ;;  %v1737_v27 = vpop.xlane.xlu1 %1736  ;;  %v2207_v13 = vadd.f32 %v4474_v3, %v2168_v55  ;;  %v4558_v41 = vmul.f32 0.0078125, %v1739_v22  ;;  %v1945_v59 = vmul.f32 %v4555_v46, %v4555_v46 }
 0x3f6   : > { %v3426_v8 = vpop.eup %3425  ;;  %v2206_v54 = vadd.f32 %v4474_v3, %v2167_v43  ;;  %v2166_v4 = vmul.f32 %v4462_v47, %v2127_v25  ;;  %3431 = vrsqrt.f32 %v2035_v29  ;;  %v4564_v48 = vmul.f32 0.0078125, %v1737_v27 }
 0x3f7   : > { %v2126_v44 = vmul.f32 %v3426_v8, %v2094_v42  ;;  %v2034_v60 = vadd.f32 1e-05, %v2002_v32  ;;  %v1735_v33 = vpop.xlane.xlu0 %1734  ;;  %v1944_v26 = vmul.f32 %v4558_v41, %v4558_v41  ;;  %v2101_v56 = vsub.f32 %v4320_v39, %v4520_v5 }
 0x3f8   : > { %v2727_v61 = vpack.c.bf16 %v2207_v13, %v2206_v54  ;;  %v2205_v6 = vadd.f32 %v4474_v3, %v2166_v4  ;;  %v4570_v7 = vmul.f32 0.0078125, %v1735_v33  ;;  %v1943_v2 = vmul.f32 %v4564_v48, %v4564_v48 }
 0x3f9   : > { %v2165_v16 = vmul.f32 %v4462_v47, %v2126_v44  ;;  %3433 = vrsqrt.f32 %v2034_v60  ;;  %v1869_v18 = vpop.xlane.xlu1 %1868  ;;  %v2100_v31 = vsub.f32 %v4323_v28, %v4524_v52  ;;  %v2099_v39 = vsub.f32 %v4327_v10, %v4527_v19 }
 0x3fa   : > { %2783 = vst [vmem:[%s4488_s19 + $0x28] sm:$0xff] %v2727_v61   ;;  %v1913_v0 = vmul.f32 0.0078125, %v1869_v18  ;;  %v1942_v8 = vmul.f32 %v4570_v7, %v4570_v7 }
 0x3fb   : > { %v2204_v50 = vadd.f32 %v4474_v3, %v2165_v16  ;;  %v1867_v57 = vpop.xlane.xlu0 %1866  ;;  %v2098_v16 = vsub.f32 %v4331_v45, %v4536_v35 }
 0x3fc   : > { %v1977_v14 = vsub.f32 %v1913_v0, %v1945_v59  ;;  %v1912_v40 = vmul.f32 0.0078125, %v1867_v57 }
 0x3fd   : > { %v2722_v30 = vpack.c.bf16 %v2205_v6, %v2204_v50  ;;  %v1865_v23 = vpop.xlane.xlu1 %1864 }
 0x3fe   : > { %v2009_v55 = vmax.f32 %v1977_v14, 0.0  ;;  %v1976_v53 = vsub.f32 %v1912_v40, %v1944_v26  ;;  %v1911_v17 = vmul.f32 0.0078125, %v1865_v23 }
 0x3ff   : > { %2782 = vst [vmem:[%s4488_s19 + $0x20] sm:$0xff] %v2722_v30   ;;  %v1863_v24 = vpop.xlane.xlu0 %1862 }
 0x400   : > { %v3428_v22 = vpop.eup %3427  ;;  %v2041_v43 = vadd.f32 1e-05, %v2009_v55  ;;  %v2008_v25 = vmax.f32 %v1976_v53, 0.0  ;;  %v1975_v42 = vsub.f32 %v1911_v17, %v1943_v2  ;;  %v1910_v29 = vmul.f32 0.0078125, %v1863_v24 }
 0x401   : > { %v3430_v32 = vpop.eup %3429  ;;  %v2133_v27 = vmul.f32 %v3428_v22, %v2101_v56  ;;  %v1749_v13 = vpop.xlane.xlu1 %1748 }
 0x402   : > { %v2132_v54 = vmul.f32 %v3430_v32, %v2100_v31  ;;  %3435 = vrsqrt.f32 %v2041_v43  ;;  %v2040_v4 = vadd.f32 1e-05, %v2008_v25  ;;  %v2007_v44 = vmax.f32 %v1975_v42, 0.0 }
 0x403   : > { %v2172_v28 = vmul.f32 %v4462_v47, %v2133_v27  ;;  %v1974_v5 = vsub.f32 %v1910_v29, %v1942_v8  ;;  %v1747_v52 = vpop.xlane.xlu0 %1746  ;;  %v3432_v60 = vpop.eup %3431  ;;  %v4590_v14 = vmul.f32 0.0078125, %v1749_v13  ;;  %v2105_v32 = vsub.f32 %v4344_v58, %v4555_v46 }
 0x404   : > { %v2171_v33 = vmul.f32 %v4462_v47, %v2132_v54  ;;  %3437 = vrsqrt.f32 %v2040_v4  ;;  %v2039_v61 = vadd.f32 1e-05, %v2007_v44  ;;  %v2131_v18 = vmul.f32 %v3432_v60, %v2099_v39 }
 0x405   : > { %v2006_v59 = vmax.f32 %v1974_v5, 0.0  ;;  %v1745_v0 = vpop.xlane.xlu1 %1744  ;;  %v2211_v50 = vadd.f32 %v4474_v3, %v2172_v28  ;;  %v4592_v23 = vmul.f32 0.0078125, %v1747_v52  ;;  %v1949_v17 = vmul.f32 %v4590_v14, %v4590_v14 }
 0x406   : > { %v3434_v6 = vpop.eup %3433  ;;  %v2210_v10 = vadd.f32 %v4474_v3, %v2171_v33  ;;  %3439 = vrsqrt.f32 %v2039_v61  ;;  %v2170_v19 = vmul.f32 %v4462_v47, %v2131_v18  ;;  %v4596_v2 = vmul.f32 0.0078125, %v1745_v0 }
 0x407   : > { %v2130_v57 = vmul.f32 %v3434_v6, %v2098_v16  ;;  %v2038_v26 = vadd.f32 1e-05, %v2006_v59  ;;  %v1743_v40 = vpop.xlane.xlu0 %1742  ;;  %v1948_v24 = vmul.f32 %v4592_v23, %v4592_v23  ;;  %v2104_v4 = vsub.f32 %v4347_v11, %v4558_v41 }
 0x408   : > { %v2737_v30 = vpack.c.bf16 %v2211_v50, %v2210_v10  ;;  %v2209_v55 = vadd.f32 %v4474_v3, %v2170_v19  ;;  %v4604_v25 = vmul.f32 0.0078125, %v1743_v40  ;;  %v1947_v27 = vmul.f32 %v4596_v2, %v4596_v2 }
 0x409   : > { %v2169_v45 = vmul.f32 %v4462_v47, %v2130_v57  ;;  %3441 = vrsqrt.f32 %v2038_v26  ;;  %v1877_v35 = vpop.xlane.xlu1 %1876  ;;  %v2103_v58 = vsub.f32 %v4351_v1, %v4564_v48  ;;  %v2102_v1 = vsub.f32 %v4355_v49, %v4570_v7 }
 0x40a   : > { %2785 = vst [vmem:[%s4488_s19 + $0x38] sm:$0xff] %v2737_v30   ;;  %v1917_v56 = vmul.f32 0.0078125, %v1877_v35  ;;  %v1946_v46 = vmul.f32 %v4604_v25, %v4604_v25 }
 0x40b   : > { %v2208_v53 = vadd.f32 %v4474_v3, %v2169_v45  ;;  %v1875_v31 = vpop.xlane.xlu0 %1874 }
 0x40c   : > { %v1916_v22 = vmul.f32 0.0078125, %v1875_v31  ;;  %v1981_v42 = vsub.f32 %v1917_v56, %v1949_v17 }
 0x40d   : > { %v2732_v43 = vpack.c.bf16 %v2209_v55, %v2208_v53  ;;  %v1873_v29 = vpop.xlane.xlu1 %1872 }
 0x40e   : > { %v1980_v8 = vsub.f32 %v1916_v22, %v1948_v24  ;;  %v1915_v13 = vmul.f32 0.0078125, %v1873_v29  ;;  %v2013_v44 = vmax.f32 %v1981_v42, 0.0 }
 0x40f   : > { %v3436_v54 = vpop.eup %3435  ;;  %2784 = vst [vmem:[%s4488_s19 + $0x30] sm:$0xff] %v2732_v43   ;;  %v1871_v39 = vpop.xlane.xlu0 %1870 }
 0x410   : > { %v2137_v28 = vmul.f32 %v3436_v54, %v2105_v32  ;;  %v2012_v5 = vmax.f32 %v1980_v8, 0.0  ;;  %v1979_v52 = vsub.f32 %v1915_v13, %v1947_v27  ;;  %v1914_v60 = vmul.f32 0.0078125, %v1871_v39 }
 0x411   : > { %v3438_v33 = vpop.eup %3437  ;;  %v2045_v61 = vadd.f32 1e-05, %v2013_v44  ;;  %v1757_v16 = vpop.xlane.xlu1 %1756 }
 0x412   : > { %v2176_v18 = vmul.f32 %v4462_v47, %v2137_v28  ;;  %v2136_v59 = vmul.f32 %v3438_v33, %v2104_v4  ;;  %v2044_v0 = vadd.f32 1e-05, %v2012_v5  ;;  %v2011_v11 = vmax.f32 %v1979_v52, 0.0 }
 0x413   : > { %v3440_v41 = vpop.eup %3439  ;;  %3443 = vrsqrt.f32 %v2045_v61  ;;  %v1978_v6 = vsub.f32 %v1914_v60, %v1946_v46  ;;  %v1755_v50 = vpop.xlane.xlu0 %1754  ;;  %v4623_v35 = vmul.f32 0.0078125, %v1757_v16  ;;  %v2109_v33 = vsub.f32 %v4368_v37, %v4590_v14 }
 0x414   : > { %v2175_v10 = vmul.f32 %v4462_v47, %v2136_v59  ;;  %v2135_v19 = vmul.f32 %v3440_v41, %v2103_v58  ;;  %3445 = vrsqrt.f32 %v2044_v0  ;;  %v2043_v48 = vadd.f32 1e-05, %v2011_v11 }
 0x415   : > { %v2010_v57 = vmax.f32 %v1978_v6, 0.0  ;;  %v1753_v26 = vpop.xlane.xlu1 %1752  ;;  %v2215_v30 = vadd.f32 %v4474_v3, %v2176_v18  ;;  %v4626_v24 = vmul.f32 0.0078125, %v1755_v50  ;;  %v1953_v22 = vmul.f32 %v4623_v35, %v4623_v35 }
 0x416   : > { %v3442_v40 = vpop.eup %3441  ;;  %v2214_v45 = vadd.f32 %v4474_v3, %v2175_v10  ;;  %v2174_v55 = vmul.f32 %v4462_v47, %v2135_v19  ;;  %3447 = vrsqrt.f32 %v2043_v48  ;;  %v4632_v43 = vmul.f32 0.0078125, %v1753_v26 }
 0x417   : > { %v2134_v53 = vmul.f32 %v3442_v40, %v2102_v1  ;;  %v2042_v17 = vadd.f32 1e-05, %v2010_v57  ;;  %v1751_v56 = vpop.xlane.xlu0 %1750  ;;  %v1952_v8 = vmul.f32 %v4626_v24, %v4626_v24  ;;  %v2108_v58 = vsub.f32 %v4371_v15, %v4592_v23 }
 0x418   : > { %v2747_v31 = vpack.c.bf16 %v2215_v30, %v2214_v45  ;;  %v2213_v29 = vadd.f32 %v4474_v3, %v2174_v55  ;;  %v4638_v44 = vmul.f32 0.0078125, %v1751_v56  ;;  %v1951_v28 = vmul.f32 %v4632_v43, %v4632_v43 }
 0x419   : > { %v2173_v49 = vmul.f32 %v4462_v47, %v2134_v53  ;;  %3449 = vrsqrt.f32 %v2042_v17  ;;  %v1885_v7 = vpop.xlane.xlu1 %1884  ;;  %v2107_v37 = vsub.f32 %v4375_v12, %v4596_v2  ;;  %v2106_v40 = vsub.f32 %v4379_v38, %v4604_v25 }
 0x41a   : > { %2787 = vst [vmem:[%s4488_s19 + $0x48] sm:$0xff] %v2747_v31   ;;  %v1921_v42 = vmul.f32 0.0078125, %v1885_v7  ;;  %v1950_v6 = vmul.f32 %v4638_v44, %v4638_v44 }
 0x41b   : > { %v2212_v32 = vadd.f32 %v4474_v3, %v2173_v49  ;;  %v1883_v27 = vpop.xlane.xlu0 %1882 }
 0x41c   : > { %v1985_v13 = vsub.f32 %v1921_v42, %v1953_v22  ;;  %v1920_v54 = vmul.f32 0.0078125, %v1883_v27 }
 0x41d   : > { %v2742_v4 = vpack.c.bf16 %v2213_v29, %v2212_v32  ;;  %v1881_v39 = vpop.xlane.xlu1 %1880 }
 0x41e   : > { %v2017_v5 = vmax.f32 %v1985_v13, 0.0  ;;  %v1984_v52 = vsub.f32 %v1920_v54, %v1952_v8  ;;  %v1919_v60 = vmul.f32 0.0078125, %v1881_v39 }
 0x41f   : > { %2786 = vst [vmem:[%s4488_s19 + $0x40] sm:$0xff] %v2742_v4   ;;  %v1879_v46 = vpop.xlane.xlu0 %1878 }
 0x420   : > { %v3444_v61 = vpop.eup %3443  ;;  %v2049_v16 = vadd.f32 1e-05, %v2017_v5  ;;  %v2016_v18 = vmax.f32 %v1984_v52, 0.0  ;;  %v1983_v59 = vsub.f32 %v1919_v60, %v1951_v28  ;;  %v1918_v0 = vmul.f32 0.0078125, %v1879_v46 }
 0x421   : > { %v3446_v11 = vpop.eup %3445  ;;  %v2141_v41 = vmul.f32 %v3444_v61, %v2109_v33  ;;  %v1765_v50 = vpop.xlane.xlu1 %1764  ;;  %v2113_v33 = vsub.f32 %v4392_v51, %v4623_v35  ;;  %v2111_v51 = vsub.f32 %v4399_v63, %v4632_v43  ;;  %v2110_v63 = vsub.f32 %v4403_v62, %v4638_v44 }
 0x422   : > { %v2140_v10 = vmul.f32 %v3446_v11, %v2108_v58  ;;  %3451 = vrsqrt.f32 %v2049_v16  ;;  %v2048_v19 = vadd.f32 1e-05, %v2016_v18  ;;  %v2015_v1 = vmax.f32 %v1983_v59, 0.0 }
 0x423   : > { %v2180_v15 = vmul.f32 %v4462_v47, %v2141_v41  ;;  %v1982_v14 = vsub.f32 %v1918_v0, %v1950_v6  ;;  %v1763_v23 = vpop.xlane.xlu0 %1762  ;;  %v3448_v48 = vpop.eup %3447  ;;  %v4664_v29 = vmul.f32 0.0078125, %v1765_v50  ;;  %v2112_v18 = vsub.f32 %v4395_v21, %v4626_v24 }
 0x424   : > { %v2179_v57 = vmul.f32 %v4462_v47, %v2140_v10  ;;  %3453 = vrsqrt.f32 %v2048_v19  ;;  %v2047_v26 = vadd.f32 1e-05, %v2015_v1  ;;  %v2139_v30 = vmul.f32 %v3448_v48, %v2107_v37 }
 0x425   : > { %v2014_v45 = vmax.f32 %v1982_v14, 0.0  ;;  %v1761_v55 = vpop.xlane.xlu1 %1760  ;;  %v2219_v17 = vadd.f32 %v4474_v3, %v2180_v15  ;;  %v4672_v5 = vmul.f32 0.0078125, %v1763_v23  ;;  %v1957_v58 = vmul.f32 %v4664_v29, %v4664_v29 }
 0x426   : > { %v3450_v53 = vpop.eup %3449  ;;  %v2218_v12 = vadd.f32 %v4474_v3, %v2179_v57  ;;  %3455 = vrsqrt.f32 %v2047_v26  ;;  %v2178_v2 = vmul.f32 %v4462_v47, %v2139_v30  ;;  %v4658_v22 = vmul.f32 0.0078125, %v1761_v55 }
 0x427   : > { %v2138_v56 = vmul.f32 %v3450_v53, %v2106_v40  ;;  %v2046_v31 = vadd.f32 1e-05, %v2014_v45  ;;  %v1759_v49 = vpop.xlane.xlu0 %1758  ;;  %v1956_v35 = vmul.f32 %v4672_v5, %v4672_v5 }
 0x428   : > { %v2757_v7 = vpack.c.bf16 %v2219_v17, %v2218_v12  ;;  %v4660_v42 = vmul.f32 0.0078125, %v1759_v49  ;;  %v2217_v32 = vadd.f32 %v4474_v3, %v2178_v2  ;;  %v1955_v8 = vmul.f32 %v4658_v22, %v4658_v22 }
 0x429   : > { %v2177_v38 = vmul.f32 %v4462_v47, %v2138_v56  ;;  %3457 = vrsqrt.f32 %v2046_v31  ;;  %v1889_v25 = vpop.xlane.xlu1 %1888  ;;  %v2115_v56 = vsub.f32 %v4423_v20, %v4658_v22  ;;  %v2116_v20 = vsub.f32 %v4419_v9, %v4672_v5 }
 0x42a   : > { %2789 = vst [vmem:[%s4488_s19 + $0x58] sm:$0xff] %v2757_v7   ;;  %v1923_v13 = vmul.f32 0.0078125, %v1889_v25  ;;  %v1954_v4 = vmul.f32 %v4660_v42, %v4660_v42  ;;  %v2114_v49 = vsub.f32 %v4427_v36, %v4660_v42 }
 0x42b   : > { %v2216_v27 = vadd.f32 %v4474_v3, %v2177_v38  ;;  %v1887_v54 = vpop.xlane.xlu0 %1886 }
 0x42c   : > { %v1922_v39 = vmul.f32 0.0078125, %v1887_v54  ;;  %v1987_v52 = vsub.f32 %v1923_v13, %v1955_v8 }
 0x42d   : > { %v2752_v28 = vpack.c.bf16 %v2217_v32, %v2216_v27  ;;  %v1893_v60 = vpop.xlane.xlu1 %1892  ;;  %v2117_v32 = vsub.f32 %v4416_v34, %v4664_v29 }
 0x42e   : > { %v1986_v46 = vsub.f32 %v1922_v39, %v1954_v4  ;;  %v1925_v61 = vmul.f32 0.0078125, %v1893_v60  ;;  %v2019_v59 = vmax.f32 %v1987_v52, 0.0 }
 0x42f   : > { %v3452_v16 = vpop.eup %3451  ;;  %2788 = vst [vmem:[%s4488_s19 + $0x50] sm:$0xff] %v2752_v28   ;;  %v1891_v0 = vpop.xlane.xlu0 %1890 }
 0x430   : > { %v2145_v11 = vmul.f32 %v3452_v16, %v2113_v33  ;;  %v2018_v41 = vmax.f32 %v1986_v46, 0.0  ;;  %v1989_v6 = vsub.f32 %v1925_v61, %v1957_v58  ;;  %v1924_v50 = vmul.f32 0.0078125, %v1891_v0 }
 0x431   : > { %v3454_v10 = vpop.eup %3453  ;;  %v2051_v19 = vadd.f32 1e-05, %v2019_v59 }
 0x432   : > { %v2184_v1 = vmul.f32 %v4462_v47, %v2145_v11  ;;  %v2144_v37 = vmul.f32 %v3454_v10, %v2112_v18  ;;  %v2050_v15 = vadd.f32 1e-05, %v2018_v41  ;;  %v2021_v14 = vmax.f32 %v1989_v6, 0.0 }
 0x433   : > { %v3456_v21 = vpop.eup %3455  ;;  %3459 = vrsqrt.f32 %v2051_v19  ;;  %v1988_v24 = vsub.f32 %v1924_v50, %v1956_v35 }
 0x434   : > { %v2183_v23 = vmul.f32 %v4462_v47, %v2144_v37  ;;  %v2143_v48 = vmul.f32 %v3456_v21, %v2111_v51  ;;  %3461 = vrsqrt.f32 %v2050_v15  ;;  %v2053_v43 = vadd.f32 1e-05, %v2021_v14 }
 0x435   : > { %v2020_v57 = vmax.f32 %v1988_v24, 0.0  ;;  %v2223_v40 = vadd.f32 %v4474_v3, %v2184_v1 }
 0x436   : > { %v3458_v26 = vpop.eup %3457  ;;  %v2222_v30 = vadd.f32 %v4474_v3, %v2183_v23  ;;  %v2182_v45 = vmul.f32 %v4462_v47, %v2143_v48  ;;  %3463 = vrsqrt.f32 %v2053_v43 }
 0x437   : > { %v2142_v55 = vmul.f32 %v3458_v26, %v2110_v63  ;;  %v2052_v53 = vadd.f32 1e-05, %v2020_v57 }
 0x438   : > { %v2767_v17 = vpack.c.bf16 %v2223_v40, %v2222_v30  ;;  %v2221_v62 = vadd.f32 %v4474_v3, %v2182_v45 }
 0x439   : > { %v2181_v12 = vmul.f32 %v4462_v47, %v2142_v55  ;;  %3465 = vrsqrt.f32 %v2052_v53 }
 0x43a   : > { %2791 = vst [vmem:[%s4488_s19 + $0x68] sm:$0xff] %v2767_v17  }
 0x43b   : > { %v2220_v44 = vadd.f32 %v4474_v3, %v2181_v12 }
 0x43d   : > { %v2762_v2 = vpack.c.bf16 %v2221_v62, %v2220_v44 }
 0x43f   : > { %2790 = vst [vmem:[%s4488_s19 + $0x60] sm:$0xff] %v2762_v2  }
 0x440   : > { %v3460_v31 = vpop.eup %3459 }
 0x441   : > { %v3462_v7 = vpop.eup %3461  ;;  %v2147_v38 = vmul.f32 %v3460_v31, %v2115_v56 }
 0x442   : > { %v2146_v25 = vmul.f32 %v3462_v7, %v2114_v49 }
 0x443   : > { %v2186_v27 = vmul.f32 %v4462_v47, %v2147_v38  ;;  %v3464_v8 = vpop.eup %3463 }
 0x444   : > { %v2185_v13 = vmul.f32 %v4462_v47, %v2146_v25  ;;  %v2149_v22 = vmul.f32 %v3464_v8, %v2117_v32 }
 0x445   : > { %v2225_v42 = vadd.f32 %v4474_v3, %v2186_v27 }
 0x446   : > { %v3466_v36 = vpop.eup %3465  ;;  %v2224_v54 = vadd.f32 %v4474_v3, %v2185_v13  ;;  %v2188_v4 = vmul.f32 %v4462_v47, %v2149_v22 }
 0x447   : > { %v2148_v34 = vmul.f32 %v3466_v36, %v2116_v20 }
 0x448   : > { %v2772_v29 = vpack.c.bf16 %v2225_v42, %v2224_v54  ;;  %v2227_v9 = vadd.f32 %v4474_v3, %v2188_v4 }
 0x449   : > { %v2187_v39 = vmul.f32 %v4462_v47, %v2148_v34 }
 0x44a   : > { %2792 = vst [vmem:[%s4488_s19 + $0x70] sm:$0xff] %v2772_v29  }
 0x44b   : > { %v2226_v28 = vadd.f32 %v4474_v3, %v2187_v39 }
 0x44d   : > { %v2777_v5 = vpack.c.bf16 %v2227_v9, %v2226_v28 }
 0x44f   : > { %2793 = vst [vmem:[%s4488_s19 + $0x78] sm:$0xff] %v2777_v5  }
 0x450   : > { %3586 = shalt.err (!%p3583_p5)
}
 0x451   : > { %s3587_s20 = scalar_lea.hbm %s4719_s17, 2048  ;;  %s3591_s1 = scalar_lea.hbm %s4773_s9, 8192 }
 0x452   : > { %p3588_p6 = scmp.ne.s32.totalorder %s4719_s17, %s3587_s20  ;;  %p3592_p0 = scmp.lt.s32.totalorder %s4719_s17, %s4773_s9 }
 0x453   : > { %p3593_p10 = scmp.lt.s32.totalorder %s3591_s1, %s3587_s20 }
 0x454   : > { %p3589_p4 = pnand %p3588_p6, %p4800_p1 }
 0x455   : > { %p3594_p3 = por %p3593_p10, %p3592_p0 }
 0x456   : > { %p3590_p8 = pneg %p3589_p4 }
 0x458   : > { %p3595_p7 = pnand %p3594_p3, %p3590_p8 }
 0x45a   : > { %3598 = shalt.err (!%p3595_p7)
}
 0x45b   : > { %s3654_s26 = smov 64   ;;  %s3655_s15 = smov 4  }
 0x45c   : > { %3040 = dma.vmem_to_hbm [thread:$0]  (%p4800_p1), %s4721_s24, 2048, %s4719_s17, %s2389_s27, %s3654_s26, %s3654_s26, %s3655_s15  }
 0x45d PF: > { %p3067_p11 = scmp.ge.s32.totalorder %s3645_s12, 2  ;;  %s2417_s13 = sand.u32 1, %s3633_s30  }
 0x45e   : > { %p4801_p9 = scmp.ne.s32.totalorder %s4784_s16, 0  ;;  %s2418_s25 = scalar_lea.sflag [#allocation4], %s2417_s13 }
 0x460   : > { %p3057_p12 = pnand %p3067_p11, %p4801_p9 }
 0x462   : > { %p3058_p13 = pneg %p3057_p12 }
 0x464   : > { %3628 = dma.done.wait (%p3058_p13), %s2418_s25, 2048  }
 0x465   : > { %3630 = vsyncadd (%p3058_p13), %s2418_s25, 4294965248  ;;  %p24_p2 = scmp.ge.s32.totalorder %s3794_s22, 6   ;;  %s4802_s30 = smov %s3637_s10 }
 0x466   : > { %s4803_s10 = smov %s3641_s11  ;;  %s4804_s11 = smov %s3804_s29 }
 0x467   : > { %s4805_s12 = smov %s3794_s22  ;;  %26 = sbr.rel (!%p24_p2) target bundleno = 11 (0xb), region = 113 }
 0x46c   :  { %2423 = vsyncpa [#allocation3], 1 }
 0x46d   :  { %2425 = vsyncpa [#allocation3 + $0x1], 1 }
 0x46e   :  { %2426 = vsyncpa [#allocation6], 1 }
 0x46f   :  { %2427 = vsyncpa [#allocation9], 1 }
 0x470   :  { %2428 = vsyncpa [#allocation4], 1 }
 0x471   :  { %2430 = vsyncpa [#allocation4 + $0x1], 1 }

</bundles_post_ra>
